<compile_context>
chip_gen: v6e
topology: v6e:2x2x1
jax: 0.10.0
libtpu: 0.0.40
codegen_flags: <defaults>
</compile_context>

<pallas_src>
import math

import jax
import jax.numpy as jnp
from jax.experimental import pallas as pl
from jax.experimental.pallas import tpu as pltpu

# ---------------------------------------------------------------------------
# Model hyper-parameters (small synthetic BERT)
# ---------------------------------------------------------------------------
VOCAB = 100
VOCAB_PAD = 128          # pad vocab to a full lane width for the one-hot gather
SEQ = 8                  # num_words (after halving the text tensor)
HIDDEN = 32
NUM_HEADS = 2
HEAD_DIM = HIDDEN // NUM_HEADS
INTERMEDIATE = 64
NUM_LAYERS = 2
LN_EPS = 1e-12
BATCH = 2


def _layer_norm(v, gamma, beta):
    mu = jnp.mean(v, axis=-1, keepdims=True)
    var = jnp.mean((v - mu) ** 2, axis=-1, keepdims=True)
    return (v - mu) * jax.lax.rsqrt(var + LN_EPS) * gamma + beta


# ---------------------------------------------------------------------------
# Fused kernel: one sequence per grid step
#   embeddings (one-hot matmul gather) + LN + NUM_LAYERS layers + CLS slice
# ---------------------------------------------------------------------------
def fused_text_encoder_kernel(
        ids_ref,                         # (S, 1)  int32   token ids (column layout)
        mask_ref,                        # (1, S)  int32   attention mask
        word_ref,                        # (VOCAB_PAD, H)  word embedding table
        pos_ref,                         # (S, H)          position embeddings
        tok_ref,                         # (2, H)          token-type embeddings (type 0 used)
        emb_g_ref, emb_b_ref,            # (1, H)          embedding LayerNorm
        wqkv_ref, bqkv_ref,              # (L, H, 3H), (L, 1, 3H)  fused QKV
        wo_ref, bo_ref,                  # (L, H, H),  (L, 1, H)
        ln1_g_ref, ln1_b_ref,            # (L, 1, H)
        w1_ref, b1_ref,                  # (L, H, I),  (L, 1, I)
        w2_ref, b2_ref,                  # (L, I, H),  (L, 1, H)
        ln2_g_ref, ln2_b_ref,            # (L, 1, H)
        out_ref):                        # (1, H)  CLS output for this sequence
    # ---- embeddings via one-hot matmul gather (single MXU push, no scalar loop)
    iota_v = jax.lax.broadcasted_iota(jnp.int32, (SEQ, VOCAB_PAD), 1)      # (S, 128)
    onehot = (iota_v == ids_ref[...]).astype(jnp.float32)                  # (S, 128)
    x = jnp.dot(onehot, word_ref[...], preferred_element_type=jnp.float32)  # (S, H)
    x = x + pos_ref[...] + tok_ref[0:1, :]                                  # token type 0
    x = _layer_norm(x, emb_g_ref[...], emb_b_ref[...])

    # ---- BERT-style additive attention mask
    add_mask = (1.0 - mask_ref[...].astype(jnp.float32)) * -10000.0        # (1, S)
    scale = 1.0 / math.sqrt(HEAD_DIM)

    for l in range(NUM_LAYERS):                                            # static unroll
        # fused QKV projection for the whole sequence
        qkv = jnp.dot(x, wqkv_ref[l],
                      preferred_element_type=jnp.float32) + bqkv_ref[l]     # (S, 3H)

        ctx_heads = []
        for h in range(NUM_HEADS):                                         # static unroll
            lo = h * HEAD_DIM
            qh = qkv[:, lo:lo + HEAD_DIM]                                   # (S, D)
            kh = qkv[:, HIDDEN + lo:HIDDEN + lo + HEAD_DIM]                 # (S, D)
            vh = qkv[:, 2 * HIDDEN + lo:2 * HIDDEN + lo + HEAD_DIM]         # (S, D)

            s = jnp.dot(qh, kh.T, preferred_element_type=jnp.float32)
            s = s * scale + add_mask                                        # (S, S)
            s = s - jnp.max(s, axis=-1, keepdims=True)
            p = jnp.exp(s)
            # EUP approx reciprocal (~1e-3 rel err); use exact divide for
            # bit-level parity with the PyTorch BERT if required.
            p = p * pl.reciprocal(jnp.sum(p, axis=-1, keepdims=True),
                                  approx=True)
            ctx_heads.append(jnp.dot(p, vh,
                                     preferred_element_type=jnp.float32))   # (S, D)

        # both 16-lane head blocks live inside one 128-lane vreg -> in-vreg
        # placement, single output-projection matmul against the full Wo.
        ctx = jnp.concatenate(ctx_heads, axis=-1)                           # (S, H)
        attn = jnp.dot(ctx, wo_ref[l],
                       preferred_element_type=jnp.float32) + bo_ref[l]      # (S, H)

        h1 = _layer_norm(x + attn, ln1_g_ref[l], ln1_b_ref[l])

        ff = jnp.dot(h1, w1_ref[l], preferred_element_type=jnp.float32) + b1_ref[l]
        # tanh-approximate GELU (HF BERT default uses erf GELU; ~1e-3 delta)
        ff = jax.nn.gelu(ff, approximate=True)
        ff = jnp.dot(ff, w2_ref[l], preferred_element_type=jnp.float32) + b2_ref[l]

        x = _layer_norm(h1 + ff, ln2_g_ref[l], ln2_b_ref[l])

    # ---- hidden_states[:, 0] : single CLS-row store
    out_ref[...] = x[0:1, :]


def _full_spec(arr):
    """Full-array VMEM block with a constant index map (fetched once, resident)."""
    nd = arr.ndim
    return pl.BlockSpec(arr.shape, lambda b, _nd=nd: (0,) * _nd)


def text_encoder_forward(text, params):
    """Text_Encoder.forward: text (B, 2*SEQ) int32 -> (B, HIDDEN) f32 CLS."""
    B, two_n = text.shape
    n = two_n // 2
    # wrapper-side layout plumbing only: split `text`, put ids in sublane
    # (column) orientation so the one-hot compare needs no in-kernel transpose.
    ids3d = text[:, :n].reshape(B, n, 1)           # (B, S, 1) int32
    mask3d = text[:, n:].reshape(B, 1, n)          # (B, 1, S) int32

    weights = (
        params["word_emb"], params["pos_emb"], params["tok_emb"],
        params["emb_ln_g"], params["emb_ln_b"],
        params["wqkv"], params["bqkv"], params["wo"], params["bo"],
        params["ln1_g"], params["ln1_b"],
        params["w1"], params["b1"], params["w2"], params["b2"],
        params["ln2_g"], params["ln2_b"],
    )

    out = pl.pallas_call(
        fused_text_encoder_kernel,
        out_shape=jax.ShapeDtypeStruct((B, 1, HIDDEN), jnp.float32),
        grid=(B,),
        in_specs=[
            pl.BlockSpec((None, SEQ, 1), lambda b: (b, 0, 0)),   # ids  -> (S, 1)
            pl.BlockSpec((None, 1, SEQ), lambda b: (b, 0, 0)),   # mask -> (1, S)
        ] + [_full_spec(w) for w in weights],
        out_specs=pl.BlockSpec((None, 1, HIDDEN), lambda b: (b, 0, 0)),
        compiler_params=pltpu.CompilerParams(
            dimension_semantics=("parallel",)),   # shards batch over TCs on v7x
    )(ids3d, mask3d, *weights)
    return out.reshape(B, HIDDEN)


# ---------------------------------------------------------------------------
# Deterministic parameter initialization (synthetic BERT weights, pre-stacked)
# ---------------------------------------------------------------------------
def init_params(key):
    keys = iter(jax.random.split(key, 32))
    nrm = lambda shp: jax.random.normal(next(keys), shp, jnp.float32) * 0.02
    L, H, I = NUM_LAYERS, HIDDEN, INTERMEDIATE
    word = nrm((VOCAB, H))
    # 2-D word table, vocab padded to 128 rows (one contiguous VMEM slab).
    word_pad = jnp.zeros((VOCAB_PAD, H), jnp.float32).at[:VOCAB].set(word)
    return {
        "word_emb": word_pad,
        "pos_emb": nrm((SEQ, H)),
        "tok_emb": nrm((2, H)),
        "emb_ln_g": jnp.ones((1, H), jnp.float32),
        "emb_ln_b": jnp.zeros((1, H), jnp.float32),
        "wqkv": nrm((L, H, 3 * H)),                 # fused [Wq | Wk | Wv]
        "bqkv": jnp.zeros((L, 1, 3 * H), jnp.float32),
        "wo": nrm((L, H, H)),
        "bo": jnp.zeros((L, 1, H), jnp.float32),
        "ln1_g": jnp.ones((L, 1, H), jnp.float32),
        "ln1_b": jnp.zeros((L, 1, H), jnp.float32),
        "w1": nrm((L, H, I)),
        "b1": jnp.zeros((L, 1, I), jnp.float32),
        "w2": nrm((L, I, H)),
        "b2": jnp.zeros((L, 1, H), jnp.float32),
        "ln2_g": jnp.ones((L, 1, H), jnp.float32),
        "ln2_b": jnp.zeros((L, 1, H), jnp.float32),
    }


# ---------------------------------------------------------------------------
# Pure-JAX reference (mirrors the kernel math) for a correctness check
# ---------------------------------------------------------------------------
def reference_forward(text, params):
    B, two_n = text.shape
    n = two_n // 2
    ids = text[:, :n]
    att = text[:, n:].astype(jnp.float32)
    word = jnp.take(params["word_emb"], ids, axis=0)                   # (B, n, H)
    emb = word + params["pos_emb"][None] + params["tok_emb"][0][None, None]
    x = _layer_norm(emb, params["emb_ln_g"], params["emb_ln_b"])
    add_mask = (1.0 - att) * -10000.0
    scale = 1.0 / math.sqrt(HEAD_DIM)
    for l in range(NUM_LAYERS):
        qkv = x @ params["wqkv"][l] + params["bqkv"][l]
        q, k, v = jnp.split(qkv, 3, axis=-1)
        qh = q.reshape(B, n, NUM_HEADS, HEAD_DIM).transpose(0, 2, 1, 3)
        kh = k.reshape(B, n, NUM_HEADS, HEAD_DIM).transpose(0, 2, 1, 3)
        vh = v.reshape(B, n, NUM_HEADS, HEAD_DIM).transpose(0, 2, 1, 3)
        s = jnp.einsum("bhqd,bhkd->bhqk", qh, kh) * scale
        s = s + add_mask[:, None, None, :]
        p = jax.nn.softmax(s, axis=-1)
        ctx = jnp.einsum("bhqk,bhkd->bhqd", p, vh)
        ctx = ctx.transpose(0, 2, 1, 3).reshape(B, n, HIDDEN)
        attn = ctx @ params["wo"][l] + params["bo"][l]
        h1 = _layer_norm(x + attn, params["ln1_g"][l], params["ln1_b"][l])
        ff = h1 @ params["w1"][l] + params["b1"][l]
        ff = jax.nn.gelu(ff, approximate=True)
        ff = ff @ params["w2"][l] + params["b2"][l]
        x = _layer_norm(h1 + ff, params["ln2_g"][l], params["ln2_b"][l])
    return x[:, 0]


if __name__ == "__main__":
    key = jax.random.PRNGKey(0)
    pkey, ikey, mkey = jax.random.split(key, 3)

    params = init_params(pkey)

    ids = jax.random.randint(ikey, (BATCH, SEQ), 0, VOCAB, dtype=jnp.int32)
    # attention mask: first token always attended, some padding elsewhere
    mask = (jax.random.uniform(mkey, (BATCH, SEQ)) > 0.25).astype(jnp.int32)
    mask = mask.at[:, 0].set(1)
    text = jnp.concatenate([ids, mask], axis=1)              # (B, 2*SEQ) int32

    fwd = jax.jit(text_encoder_forward)
    out = fwd(text, params)
    jax.block_until_ready(out)

    assert out.shape == (BATCH, HIDDEN), out.shape
    assert out.dtype == jnp.float32

    ref = reference_forward(text, params)
    max_err = float(jnp.max(jnp.abs(out - ref)))
    assert max_err < 3e-2, f"max abs err {max_err}"

    print("KERNEL_OK")
</pallas_src>

<mosaic_0001>
module attributes {stable_mosaic.version = 11 : i64} {
  func.func @fused_text_encoder_kernel(%arg0: i32, %arg1: memref<1x8x1xi32, #tpu.memory_space<vmem>>, %arg2: memref<1x1x8xi32, #tpu.memory_space<vmem>>, %arg3: memref<128x32xf32, #tpu.memory_space<vmem>>, %arg4: memref<8x32xf32, #tpu.memory_space<vmem>>, %arg5: memref<2x32xf32, #tpu.memory_space<vmem>>, %arg6: memref<1x32xf32, #tpu.memory_space<vmem>>, %arg7: memref<1x32xf32, #tpu.memory_space<vmem>>, %arg8: memref<2x32x96xf32, #tpu.memory_space<vmem>>, %arg9: memref<2x1x96xf32, #tpu.memory_space<vmem>>, %arg10: memref<2x32x32xf32, #tpu.memory_space<vmem>>, %arg11: memref<2x1x32xf32, #tpu.memory_space<vmem>>, %arg12: memref<2x1x32xf32, #tpu.memory_space<vmem>>, %arg13: memref<2x1x32xf32, #tpu.memory_space<vmem>>, %arg14: memref<2x32x64xf32, #tpu.memory_space<vmem>>, %arg15: memref<2x1x64xf32, #tpu.memory_space<vmem>>, %arg16: memref<2x64x32xf32, #tpu.memory_space<vmem>>, %arg17: memref<2x1x32xf32, #tpu.memory_space<vmem>>, %arg18: memref<2x1x32xf32, #tpu.memory_space<vmem>>, %arg19: memref<2x1x32xf32, #tpu.memory_space<vmem>>, %arg20: memref<1x1x32xf32, #tpu.memory_space<vmem>>) attributes {dimension_semantics = [#tpu.dimension_semantics<parallel>], iteration_bounds = array<i64: 2>, scalar_prefetch = 0 : i64, scratch_operands = 0 : i64, tpu.core_type = #tpu.core_type<tc>, window_params = [{transform_indices = @transform_0, window_bounds = array<i64: 1, 8, 1>}, {transform_indices = @transform_1, window_bounds = array<i64: 1, 1, 8>}, {pipeline_mode = #tpu.pipeline_mode<synchronous>, transform_indices = @transform_2, window_bounds = array<i64: 128, 32>}, {pipeline_mode = #tpu.pipeline_mode<synchronous>, transform_indices = @transform_3, window_bounds = array<i64: 8, 32>}, {pipeline_mode = #tpu.pipeline_mode<synchronous>, transform_indices = @transform_4, window_bounds = array<i64: 2, 32>}, {pipeline_mode = #tpu.pipeline_mode<synchronous>, transform_indices = @transform_5, window_bounds = array<i64: 1, 32>}, {pipeline_mode = #tpu.pipeline_mode<synchronous>, transform_indices = @transform_6, window_bounds = array<i64: 1, 32>}, {pipeline_mode = #tpu.pipeline_mode<synchronous>, transform_indices = @transform_7, window_bounds = array<i64: 2, 32, 96>}, {pipeline_mode = #tpu.pipeline_mode<synchronous>, transform_indices = @transform_8, window_bounds = array<i64: 2, 1, 96>}, {pipeline_mode = #tpu.pipeline_mode<synchronous>, transform_indices = @transform_9, window_bounds = array<i64: 2, 32, 32>}, {pipeline_mode = #tpu.pipeline_mode<synchronous>, transform_indices = @transform_10, window_bounds = array<i64: 2, 1, 32>}, {pipeline_mode = #tpu.pipeline_mode<synchronous>, transform_indices = @transform_11, window_bounds = array<i64: 2, 1, 32>}, {pipeline_mode = #tpu.pipeline_mode<synchronous>, transform_indices = @transform_12, window_bounds = array<i64: 2, 1, 32>}, {pipeline_mode = #tpu.pipeline_mode<synchronous>, transform_indices = @transform_13, window_bounds = array<i64: 2, 32, 64>}, {pipeline_mode = #tpu.pipeline_mode<synchronous>, transform_indices = @transform_14, window_bounds = array<i64: 2, 1, 64>}, {pipeline_mode = #tpu.pipeline_mode<synchronous>, transform_indices = @transform_15, window_bounds = array<i64: 2, 64, 32>}, {pipeline_mode = #tpu.pipeline_mode<synchronous>, transform_indices = @transform_16, window_bounds = array<i64: 2, 1, 32>}, {pipeline_mode = #tpu.pipeline_mode<synchronous>, transform_indices = @transform_17, window_bounds = array<i64: 2, 1, 32>}, {pipeline_mode = #tpu.pipeline_mode<synchronous>, transform_indices = @transform_18, window_bounds = array<i64: 2, 1, 32>}, {transform_indices = @transform_19, window_bounds = array<i64: 1, 1, 32>}]} {
    %0 = tpu.iota {dimensions = array<i32: 1>} : vector<8x128xi32>
    %c0 = arith.constant 0 : index
    %c0_0 = arith.constant 0 : index
    %c0_1 = arith.constant 0 : index
    %1 = vector.load %arg1[%c0, %c0_0, %c0_1] : memref<1x8x1xi32, #tpu.memory_space<vmem>>, vector<1x8x1xi32>
    %2 = vector.shape_cast %1 : vector<1x8x1xi32> to vector<8x1xi32>
    %3 = vector.broadcast %2 : vector<8x1xi32> to vector<8x128xi32>
    %4 = arith.cmpi eq, %0, %3 : vector<8x128xi32>
    %5 = arith.extui %4 : vector<8x128xi1> to vector<8x128xi32>
    %6 = arith.sitofp %5 : vector<8x128xi32> to vector<8x128xf32>
    %c0_2 = arith.constant 0 : index
    %c0_3 = arith.constant 0 : index
    %7 = vector.load %arg3[%c0_2, %c0_3] : memref<128x32xf32, #tpu.memory_space<vmem>>, vector<128x32xf32>
    %cst = arith.constant dense<0.000000e+00> : vector<8x32xf32>
    %8 = tpu.matmul %6, %7, %cst {dimension_numbers = #tpu.dot_dimension_numbers<[1], [0], [0], [1], [0, 0, 1, 1], [], []>} : vector<8x128xf32>, vector<128x32xf32>, vector<8x32xf32> -> vector<8x32xf32>
    %c0_4 = arith.constant 0 : index
    %c0_5 = arith.constant 0 : index
    %9 = vector.load %arg4[%c0_4, %c0_5] : memref<8x32xf32, #tpu.memory_space<vmem>>, vector<8x32xf32>
    %10 = arith.addf %8, %9 : vector<8x32xf32>
    %c0_6 = arith.constant 0 : index
    %c0_7 = arith.constant 0 : index
    %11 = vector.load %arg5[%c0_6, %c0_7] : memref<2x32xf32, #tpu.memory_space<vmem>>, vector<1x32xf32>
    %12 = vector.broadcast %11 : vector<1x32xf32> to vector<8x32xf32>
    %13 = arith.addf %10, %12 : vector<8x32xf32>
    %c0_8 = arith.constant 0 : index
    %c0_9 = arith.constant 0 : index
    %14 = vector.load %arg6[%c0_8, %c0_9] : memref<1x32xf32, #tpu.memory_space<vmem>>, vector<1x32xf32>
    %c0_10 = arith.constant 0 : index
    %c0_11 = arith.constant 0 : index
    %15 = vector.load %arg7[%c0_10, %c0_11] : memref<1x32xf32, #tpu.memory_space<vmem>>, vector<1x32xf32>
    %cst_12 = arith.constant dense<0.000000e+00> : vector<8xf32>
    %16 = vector.multi_reduction <add>, %13, %cst_12 [1] : vector<8x32xf32> to vector<8xf32>
    %17 = vector.shape_cast %16 : vector<8xf32> to vector<8x1xf32>
    %cst_13 = arith.constant 3.200000e+01 : f32
    %18 = vector.broadcast %cst_13 : f32 to vector<8x1xf32>
    %19 = arith.divf %17, %18 : vector<8x1xf32>
    %20 = vector.broadcast %19 : vector<8x1xf32> to vector<8x32xf32>
    %21 = arith.subf %13, %20 : vector<8x32xf32>
    %22 = arith.mulf %21, %21 : vector<8x32xf32>
    %cst_14 = arith.constant dense<0.000000e+00> : vector<8xf32>
    %23 = vector.multi_reduction <add>, %22, %cst_14 [1] : vector<8x32xf32> to vector<8xf32>
    %24 = vector.shape_cast %23 : vector<8xf32> to vector<8x1xf32>
    %cst_15 = arith.constant 3.200000e+01 : f32
    %25 = vector.broadcast %cst_15 : f32 to vector<8x1xf32>
    %26 = arith.divf %24, %25 : vector<8x1xf32>
    %27 = vector.broadcast %19 : vector<8x1xf32> to vector<8x32xf32>
    %28 = arith.subf %13, %27 : vector<8x32xf32>
    %cst_16 = arith.constant 9.99999996E-13 : f32
    %29 = vector.broadcast %cst_16 : f32 to vector<8x1xf32>
    %30 = arith.addf %26, %29 : vector<8x1xf32>
    %31 = math.rsqrt %30 : vector<8x1xf32>
    %32 = vector.broadcast %31 : vector<8x1xf32> to vector<8x32xf32>
    %33 = arith.mulf %28, %32 : vector<8x32xf32>
    %34 = vector.broadcast %14 : vector<1x32xf32> to vector<8x32xf32>
    %35 = arith.mulf %33, %34 : vector<8x32xf32>
    %36 = vector.broadcast %15 : vector<1x32xf32> to vector<8x32xf32>
    %37 = arith.addf %35, %36 : vector<8x32xf32>
    %c0_17 = arith.constant 0 : index
    %c0_18 = arith.constant 0 : index
    %c0_19 = arith.constant 0 : index
    %38 = vector.load %arg2[%c0_17, %c0_18, %c0_19] : memref<1x1x8xi32, #tpu.memory_space<vmem>>, vector<1x1x8xi32>
    %39 = vector.shape_cast %38 : vector<1x1x8xi32> to vector<1x8xi32>
    %40 = arith.sitofp %39 : vector<1x8xi32> to vector<1x8xf32>
    %cst_20 = arith.constant 1.000000e+00 : f32
    %41 = vector.broadcast %cst_20 : f32 to vector<1x8xf32>
    %42 = arith.subf %41, %40 : vector<1x8xf32>
    %cst_21 = arith.constant -1.000000e+04 : f32
    %43 = vector.broadcast %cst_21 : f32 to vector<1x8xf32>
    %44 = arith.mulf %42, %43 : vector<1x8xf32>
    %c0_22 = arith.constant 0 : index
    %c0_23 = arith.constant 0 : index
    %c0_24 = arith.constant 0 : index
    %45 = vector.load %arg8[%c0_22, %c0_23, %c0_24] : memref<2x32x96xf32, #tpu.memory_space<vmem>>, vector<1x32x96xf32>
    %46 = vector.shape_cast %45 : vector<1x32x96xf32> to vector<32x96xf32>
    %cst_25 = arith.constant dense<0.000000e+00> : vector<8x96xf32>
    %47 = tpu.matmul %37, %46, %cst_25 {dimension_numbers = #tpu.dot_dimension_numbers<[1], [0], [0], [1], [0, 0, 1, 1], [], []>} : vector<8x32xf32>, vector<32x96xf32>, vector<8x96xf32> -> vector<8x96xf32>
    %c0_26 = arith.constant 0 : index
    %c0_27 = arith.constant 0 : index
    %c0_28 = arith.constant 0 : index
    %48 = vector.load %arg9[%c0_26, %c0_27, %c0_28] : memref<2x1x96xf32, #tpu.memory_space<vmem>>, vector<1x1x96xf32>
    %49 = vector.shape_cast %48 : vector<1x1x96xf32> to vector<1x96xf32>
    %50 = vector.broadcast %49 : vector<1x96xf32> to vector<8x96xf32>
    %51 = arith.addf %47, %50 : vector<8x96xf32>
    %52 = vector.extract_strided_slice %51 {offsets = [0, 0], sizes = [8, 16], strides = [1, 1]} : vector<8x96xf32> to vector<8x16xf32>
    %53 = vector.extract_strided_slice %51 {offsets = [0, 32], sizes = [8, 16], strides = [1, 1]} : vector<8x96xf32> to vector<8x16xf32>
    %54 = vector.extract_strided_slice %51 {offsets = [0, 64], sizes = [8, 16], strides = [1, 1]} : vector<8x96xf32> to vector<8x16xf32>
    %55 = tpu.transpose %53, [1, 0] : vector<8x16xf32> -> vector<16x8xf32>
    %cst_29 = arith.constant dense<0.000000e+00> : vector<8x8xf32>
    %56 = tpu.matmul %52, %55, %cst_29 {dimension_numbers = #tpu.dot_dimension_numbers<[1], [0], [0], [1], [0, 0, 1, 1], [], []>} : vector<8x16xf32>, vector<16x8xf32>, vector<8x8xf32> -> vector<8x8xf32>
    %cst_30 = arith.constant 2.500000e-01 : f32
    %57 = vector.broadcast %cst_30 : f32 to vector<8x8xf32>
    %58 = arith.mulf %56, %57 : vector<8x8xf32>
    %59 = vector.broadcast %44 : vector<1x8xf32> to vector<8x8xf32>
    %60 = arith.addf %58, %59 : vector<8x8xf32>
    %cst_31 = arith.constant dense<0xFF800000> : vector<8xf32>
    %61 = vector.multi_reduction <maximumf>, %60, %cst_31 [1] : vector<8x8xf32> to vector<8xf32>
    %62 = vector.shape_cast %61 : vector<8xf32> to vector<8x1xf32>
    %63 = vector.broadcast %62 : vector<8x1xf32> to vector<8x8xf32>
    %64 = arith.subf %60, %63 : vector<8x8xf32>
    %65 = math.exp %64 : vector<8x8xf32>
    %cst_32 = arith.constant dense<0.000000e+00> : vector<8xf32>
    %66 = vector.multi_reduction <add>, %65, %cst_32 [1] : vector<8x8xf32> to vector<8xf32>
    %67 = vector.shape_cast %66 : vector<8xf32> to vector<8x1xf32>
    %68 = tpu.reciprocal %67 {approx = true} : vector<8x1xf32> -> vector<8x1xf32>
    %69 = vector.broadcast %68 : vector<8x1xf32> to vector<8x8xf32>
    %70 = arith.mulf %65, %69 : vector<8x8xf32>
    %cst_33 = arith.constant dense<0.000000e+00> : vector<8x16xf32>
    %71 = tpu.matmul %70, %54, %cst_33 {dimension_numbers = #tpu.dot_dimension_numbers<[1], [0], [0], [1], [0, 0, 1, 1], [], []>} : vector<8x8xf32>, vector<8x16xf32>, vector<8x16xf32> -> vector<8x16xf32>
    %72 = vector.extract_strided_slice %51 {offsets = [0, 16], sizes = [8, 16], strides = [1, 1]} : vector<8x96xf32> to vector<8x16xf32>
    %73 = vector.extract_strided_slice %51 {offsets = [0, 48], sizes = [8, 16], strides = [1, 1]} : vector<8x96xf32> to vector<8x16xf32>
    %74 = vector.extract_strided_slice %51 {offsets = [0, 80], sizes = [8, 16], strides = [1, 1]} : vector<8x96xf32> to vector<8x16xf32>
    %75 = tpu.transpose %73, [1, 0] : vector<8x16xf32> -> vector<16x8xf32>
    %cst_34 = arith.constant dense<0.000000e+00> : vector<8x8xf32>
    %76 = tpu.matmul %72, %75, %cst_34 {dimension_numbers = #tpu.dot_dimension_numbers<[1], [0], [0], [1], [0, 0, 1, 1], [], []>} : vector<8x16xf32>, vector<16x8xf32>, vector<8x8xf32> -> vector<8x8xf32>
    %cst_35 = arith.constant 2.500000e-01 : f32
    %77 = vector.broadcast %cst_35 : f32 to vector<8x8xf32>
    %78 = arith.mulf %76, %77 : vector<8x8xf32>
    %79 = vector.broadcast %44 : vector<1x8xf32> to vector<8x8xf32>
    %80 = arith.addf %78, %79 : vector<8x8xf32>
    %cst_36 = arith.constant dense<0xFF800000> : vector<8xf32>
    %81 = vector.multi_reduction <maximumf>, %80, %cst_36 [1] : vector<8x8xf32> to vector<8xf32>
    %82 = vector.shape_cast %81 : vector<8xf32> to vector<8x1xf32>
    %83 = vector.broadcast %82 : vector<8x1xf32> to vector<8x8xf32>
    %84 = arith.subf %80, %83 : vector<8x8xf32>
    %85 = math.exp %84 : vector<8x8xf32>
    %cst_37 = arith.constant dense<0.000000e+00> : vector<8xf32>
    %86 = vector.multi_reduction <add>, %85, %cst_37 [1] : vector<8x8xf32> to vector<8xf32>
    %87 = vector.shape_cast %86 : vector<8xf32> to vector<8x1xf32>
    %88 = tpu.reciprocal %87 {approx = true} : vector<8x1xf32> -> vector<8x1xf32>
    %89 = vector.broadcast %88 : vector<8x1xf32> to vector<8x8xf32>
    %90 = arith.mulf %85, %89 : vector<8x8xf32>
    %cst_38 = arith.constant dense<0.000000e+00> : vector<8x16xf32>
    %91 = tpu.matmul %90, %74, %cst_38 {dimension_numbers = #tpu.dot_dimension_numbers<[1], [0], [0], [1], [0, 0, 1, 1], [], []>} : vector<8x8xf32>, vector<8x16xf32>, vector<8x16xf32> -> vector<8x16xf32>
    %92 = tpu.concatenate %71, %91 in 1 : vector<8x16xf32>, vector<8x16xf32> -> vector<8x32xf32>
    %c0_39 = arith.constant 0 : index
    %c0_40 = arith.constant 0 : index
    %c0_41 = arith.constant 0 : index
    %93 = vector.load %arg10[%c0_39, %c0_40, %c0_41] : memref<2x32x32xf32, #tpu.memory_space<vmem>>, vector<1x32x32xf32>
    %94 = vector.shape_cast %93 : vector<1x32x32xf32> to vector<32x32xf32>
    %cst_42 = arith.constant dense<0.000000e+00> : vector<8x32xf32>
    %95 = tpu.matmul %92, %94, %cst_42 {dimension_numbers = #tpu.dot_dimension_numbers<[1], [0], [0], [1], [0, 0, 1, 1], [], []>} : vector<8x32xf32>, vector<32x32xf32>, vector<8x32xf32> -> vector<8x32xf32>
    %c0_43 = arith.constant 0 : index
    %c0_44 = arith.constant 0 : index
    %c0_45 = arith.constant 0 : index
    %96 = vector.load %arg11[%c0_43, %c0_44, %c0_45] : memref<2x1x32xf32, #tpu.memory_space<vmem>>, vector<1x1x32xf32>
    %97 = vector.shape_cast %96 : vector<1x1x32xf32> to vector<1x32xf32>
    %98 = vector.broadcast %97 : vector<1x32xf32> to vector<8x32xf32>
    %99 = arith.addf %95, %98 : vector<8x32xf32>
    %100 = arith.addf %37, %99 : vector<8x32xf32>
    %c0_46 = arith.constant 0 : index
    %c0_47 = arith.constant 0 : index
    %c0_48 = arith.constant 0 : index
    %101 = vector.load %arg12[%c0_46, %c0_47, %c0_48] : memref<2x1x32xf32, #tpu.memory_space<vmem>>, vector<1x1x32xf32>
    %102 = vector.shape_cast %101 : vector<1x1x32xf32> to vector<1x32xf32>
    %c0_49 = arith.constant 0 : index
    %c0_50 = arith.constant 0 : index
    %c0_51 = arith.constant 0 : index
    %103 = vector.load %arg13[%c0_49, %c0_50, %c0_51] : memref<2x1x32xf32, #tpu.memory_space<vmem>>, vector<1x1x32xf32>
    %104 = vector.shape_cast %103 : vector<1x1x32xf32> to vector<1x32xf32>
    %cst_52 = arith.constant dense<0.000000e+00> : vector<8xf32>
    %105 = vector.multi_reduction <add>, %100, %cst_52 [1] : vector<8x32xf32> to vector<8xf32>
    %106 = vector.shape_cast %105 : vector<8xf32> to vector<8x1xf32>
    %cst_53 = arith.constant 3.200000e+01 : f32
    %107 = vector.broadcast %cst_53 : f32 to vector<8x1xf32>
    %108 = arith.divf %106, %107 : vector<8x1xf32>
    %109 = vector.broadcast %108 : vector<8x1xf32> to vector<8x32xf32>
    %110 = arith.subf %100, %109 : vector<8x32xf32>
    %111 = arith.mulf %110, %110 : vector<8x32xf32>
    %cst_54 = arith.constant dense<0.000000e+00> : vector<8xf32>
    %112 = vector.multi_reduction <add>, %111, %cst_54 [1] : vector<8x32xf32> to vector<8xf32>
    %113 = vector.shape_cast %112 : vector<8xf32> to vector<8x1xf32>
    %cst_55 = arith.constant 3.200000e+01 : f32
    %114 = vector.broadcast %cst_55 : f32 to vector<8x1xf32>
    %115 = arith.divf %113, %114 : vector<8x1xf32>
    %116 = vector.broadcast %108 : vector<8x1xf32> to vector<8x32xf32>
    %117 = arith.subf %100, %116 : vector<8x32xf32>
    %cst_56 = arith.constant 9.99999996E-13 : f32
    %118 = vector.broadcast %cst_56 : f32 to vector<8x1xf32>
    %119 = arith.addf %115, %118 : vector<8x1xf32>
    %120 = math.rsqrt %119 : vector<8x1xf32>
    %121 = vector.broadcast %120 : vector<8x1xf32> to vector<8x32xf32>
    %122 = arith.mulf %117, %121 : vector<8x32xf32>
    %123 = vector.broadcast %102 : vector<1x32xf32> to vector<8x32xf32>
    %124 = arith.mulf %122, %123 : vector<8x32xf32>
    %125 = vector.broadcast %104 : vector<1x32xf32> to vector<8x32xf32>
    %126 = arith.addf %124, %125 : vector<8x32xf32>
    %c0_57 = arith.constant 0 : index
    %c0_58 = arith.constant 0 : index
    %c0_59 = arith.constant 0 : index
    %127 = vector.load %arg14[%c0_57, %c0_58, %c0_59] : memref<2x32x64xf32, #tpu.memory_space<vmem>>, vector<1x32x64xf32>
    %128 = vector.shape_cast %127 : vector<1x32x64xf32> to vector<32x64xf32>
    %cst_60 = arith.constant dense<0.000000e+00> : vector<8x64xf32>
    %129 = tpu.matmul %126, %128, %cst_60 {dimension_numbers = #tpu.dot_dimension_numbers<[1], [0], [0], [1], [0, 0, 1, 1], [], []>} : vector<8x32xf32>, vector<32x64xf32>, vector<8x64xf32> -> vector<8x64xf32>
    %c0_61 = arith.constant 0 : index
    %c0_62 = arith.constant 0 : index
    %c0_63 = arith.constant 0 : index
    %130 = vector.load %arg15[%c0_61, %c0_62, %c0_63] : memref<2x1x64xf32, #tpu.memory_space<vmem>>, vector<1x1x64xf32>
    %131 = vector.shape_cast %130 : vector<1x1x64xf32> to vector<1x64xf32>
    %132 = vector.broadcast %131 : vector<1x64xf32> to vector<8x64xf32>
    %133 = arith.addf %129, %132 : vector<8x64xf32>
    %134 = arith.mulf %133, %133 : vector<8x64xf32>
    %135 = arith.mulf %133, %134 : vector<8x64xf32>
    %cst_64 = arith.constant 4.471500e-02 : f32
    %136 = vector.broadcast %cst_64 : f32 to vector<8x64xf32>
    %137 = arith.mulf %136, %135 : vector<8x64xf32>
    %138 = arith.addf %133, %137 : vector<8x64xf32>
    %cst_65 = arith.constant 0.797884583 : f32
    %139 = vector.broadcast %cst_65 : f32 to vector<8x64xf32>
    %140 = arith.mulf %139, %138 : vector<8x64xf32>
    %141 = math.tanh %140 : vector<8x64xf32>
    %cst_66 = arith.constant 1.000000e+00 : f32
    %142 = vector.broadcast %cst_66 : f32 to vector<8x64xf32>
    %143 = arith.addf %142, %141 : vector<8x64xf32>
    %cst_67 = arith.constant 5.000000e-01 : f32
    %144 = vector.broadcast %cst_67 : f32 to vector<8x64xf32>
    %145 = arith.mulf %144, %143 : vector<8x64xf32>
    %146 = arith.mulf %133, %145 : vector<8x64xf32>
    %c0_68 = arith.constant 0 : index
    %c0_69 = arith.constant 0 : index
    %c0_70 = arith.constant 0 : index
    %147 = vector.load %arg16[%c0_68, %c0_69, %c0_70] : memref<2x64x32xf32, #tpu.memory_space<vmem>>, vector<1x64x32xf32>
    %148 = vector.shape_cast %147 : vector<1x64x32xf32> to vector<64x32xf32>
    %cst_71 = arith.constant dense<0.000000e+00> : vector<8x32xf32>
    %149 = tpu.matmul %146, %148, %cst_71 {dimension_numbers = #tpu.dot_dimension_numbers<[1], [0], [0], [1], [0, 0, 1, 1], [], []>} : vector<8x64xf32>, vector<64x32xf32>, vector<8x32xf32> -> vector<8x32xf32>
    %c0_72 = arith.constant 0 : index
    %c0_73 = arith.constant 0 : index
    %c0_74 = arith.constant 0 : index
    %150 = vector.load %arg17[%c0_72, %c0_73, %c0_74] : memref<2x1x32xf32, #tpu.memory_space<vmem>>, vector<1x1x32xf32>
    %151 = vector.shape_cast %150 : vector<1x1x32xf32> to vector<1x32xf32>
    %152 = vector.broadcast %151 : vector<1x32xf32> to vector<8x32xf32>
    %153 = arith.addf %149, %152 : vector<8x32xf32>
    %154 = arith.addf %126, %153 : vector<8x32xf32>
    %c0_75 = arith.constant 0 : index
    %c0_76 = arith.constant 0 : index
    %c0_77 = arith.constant 0 : index
    %155 = vector.load %arg18[%c0_75, %c0_76, %c0_77] : memref<2x1x32xf32, #tpu.memory_space<vmem>>, vector<1x1x32xf32>
    %156 = vector.shape_cast %155 : vector<1x1x32xf32> to vector<1x32xf32>
    %c0_78 = arith.constant 0 : index
    %c0_79 = arith.constant 0 : index
    %c0_80 = arith.constant 0 : index
    %157 = vector.load %arg19[%c0_78, %c0_79, %c0_80] : memref<2x1x32xf32, #tpu.memory_space<vmem>>, vector<1x1x32xf32>
    %158 = vector.shape_cast %157 : vector<1x1x32xf32> to vector<1x32xf32>
    %cst_81 = arith.constant dense<0.000000e+00> : vector<8xf32>
    %159 = vector.multi_reduction <add>, %154, %cst_81 [1] : vector<8x32xf32> to vector<8xf32>
    %160 = vector.shape_cast %159 : vector<8xf32> to vector<8x1xf32>
    %cst_82 = arith.constant 3.200000e+01 : f32
    %161 = vector.broadcast %cst_82 : f32 to vector<8x1xf32>
    %162 = arith.divf %160, %161 : vector<8x1xf32>
    %163 = vector.broadcast %162 : vector<8x1xf32> to vector<8x32xf32>
    %164 = arith.subf %154, %163 : vector<8x32xf32>
    %165 = arith.mulf %164, %164 : vector<8x32xf32>
    %cst_83 = arith.constant dense<0.000000e+00> : vector<8xf32>
    %166 = vector.multi_reduction <add>, %165, %cst_83 [1] : vector<8x32xf32> to vector<8xf32>
    %167 = vector.shape_cast %166 : vector<8xf32> to vector<8x1xf32>
    %cst_84 = arith.constant 3.200000e+01 : f32
    %168 = vector.broadcast %cst_84 : f32 to vector<8x1xf32>
    %169 = arith.divf %167, %168 : vector<8x1xf32>
    %170 = vector.broadcast %162 : vector<8x1xf32> to vector<8x32xf32>
    %171 = arith.subf %154, %170 : vector<8x32xf32>
    %cst_85 = arith.constant 9.99999996E-13 : f32
    %172 = vector.broadcast %cst_85 : f32 to vector<8x1xf32>
    %173 = arith.addf %169, %172 : vector<8x1xf32>
    %174 = math.rsqrt %173 : vector<8x1xf32>
    %175 = vector.broadcast %174 : vector<8x1xf32> to vector<8x32xf32>
    %176 = arith.mulf %171, %175 : vector<8x32xf32>
    %177 = vector.broadcast %156 : vector<1x32xf32> to vector<8x32xf32>
    %178 = arith.mulf %176, %177 : vector<8x32xf32>
    %179 = vector.broadcast %158 : vector<1x32xf32> to vector<8x32xf32>
    %180 = arith.addf %178, %179 : vector<8x32xf32>
    %c1 = arith.constant 1 : index
    %c0_86 = arith.constant 0 : index
    %c0_87 = arith.constant 0 : index
    %181 = vector.load %arg8[%c1, %c0_86, %c0_87] : memref<2x32x96xf32, #tpu.memory_space<vmem>>, vector<1x32x96xf32>
    %182 = vector.shape_cast %181 : vector<1x32x96xf32> to vector<32x96xf32>
    %cst_88 = arith.constant dense<0.000000e+00> : vector<8x96xf32>
    %183 = tpu.matmul %180, %182, %cst_88 {dimension_numbers = #tpu.dot_dimension_numbers<[1], [0], [0], [1], [0, 0, 1, 1], [], []>} : vector<8x32xf32>, vector<32x96xf32>, vector<8x96xf32> -> vector<8x96xf32>
    %c1_89 = arith.constant 1 : index
    %c0_90 = arith.constant 0 : index
    %c0_91 = arith.constant 0 : index
    %184 = vector.load %arg9[%c1_89, %c0_90, %c0_91] : memref<2x1x96xf32, #tpu.memory_space<vmem>>, vector<1x1x96xf32>
    %185 = vector.shape_cast %184 : vector<1x1x96xf32> to vector<1x96xf32>
    %186 = vector.broadcast %185 : vector<1x96xf32> to vector<8x96xf32>
    %187 = arith.addf %183, %186 : vector<8x96xf32>
    %188 = vector.extract_strided_slice %187 {offsets = [0, 0], sizes = [8, 16], strides = [1, 1]} : vector<8x96xf32> to vector<8x16xf32>
    %189 = vector.extract_strided_slice %187 {offsets = [0, 32], sizes = [8, 16], strides = [1, 1]} : vector<8x96xf32> to vector<8x16xf32>
    %190 = vector.extract_strided_slice %187 {offsets = [0, 64], sizes = [8, 16], strides = [1, 1]} : vector<8x96xf32> to vector<8x16xf32>
    %191 = tpu.transpose %189, [1, 0] : vector<8x16xf32> -> vector<16x8xf32>
    %cst_92 = arith.constant dense<0.000000e+00> : vector<8x8xf32>
    %192 = tpu.matmul %188, %191, %cst_92 {dimension_numbers = #tpu.dot_dimension_numbers<[1], [0], [0], [1], [0, 0, 1, 1], [], []>} : vector<8x16xf32>, vector<16x8xf32>, vector<8x8xf32> -> vector<8x8xf32>
    %cst_93 = arith.constant 2.500000e-01 : f32
    %193 = vector.broadcast %cst_93 : f32 to vector<8x8xf32>
    %194 = arith.mulf %192, %193 : vector<8x8xf32>
    %195 = vector.broadcast %44 : vector<1x8xf32> to vector<8x8xf32>
    %196 = arith.addf %194, %195 : vector<8x8xf32>
    %cst_94 = arith.constant dense<0xFF800000> : vector<8xf32>
    %197 = vector.multi_reduction <maximumf>, %196, %cst_94 [1] : vector<8x8xf32> to vector<8xf32>
    %198 = vector.shape_cast %197 : vector<8xf32> to vector<8x1xf32>
    %199 = vector.broadcast %198 : vector<8x1xf32> to vector<8x8xf32>
    %200 = arith.subf %196, %199 : vector<8x8xf32>
    %201 = math.exp %200 : vector<8x8xf32>
    %cst_95 = arith.constant dense<0.000000e+00> : vector<8xf32>
    %202 = vector.multi_reduction <add>, %201, %cst_95 [1] : vector<8x8xf32> to vector<8xf32>
    %203 = vector.shape_cast %202 : vector<8xf32> to vector<8x1xf32>
    %204 = tpu.reciprocal %203 {approx = true} : vector<8x1xf32> -> vector<8x1xf32>
    %205 = vector.broadcast %204 : vector<8x1xf32> to vector<8x8xf32>
    %206 = arith.mulf %201, %205 : vector<8x8xf32>
    %cst_96 = arith.constant dense<0.000000e+00> : vector<8x16xf32>
    %207 = tpu.matmul %206, %190, %cst_96 {dimension_numbers = #tpu.dot_dimension_numbers<[1], [0], [0], [1], [0, 0, 1, 1], [], []>} : vector<8x8xf32>, vector<8x16xf32>, vector<8x16xf32> -> vector<8x16xf32>
    %208 = vector.extract_strided_slice %187 {offsets = [0, 16], sizes = [8, 16], strides = [1, 1]} : vector<8x96xf32> to vector<8x16xf32>
    %209 = vector.extract_strided_slice %187 {offsets = [0, 48], sizes = [8, 16], strides = [1, 1]} : vector<8x96xf32> to vector<8x16xf32>
    %210 = vector.extract_strided_slice %187 {offsets = [0, 80], sizes = [8, 16], strides = [1, 1]} : vector<8x96xf32> to vector<8x16xf32>
    %211 = tpu.transpose %209, [1, 0] : vector<8x16xf32> -> vector<16x8xf32>
    %cst_97 = arith.constant dense<0.000000e+00> : vector<8x8xf32>
    %212 = tpu.matmul %208, %211, %cst_97 {dimension_numbers = #tpu.dot_dimension_numbers<[1], [0], [0], [1], [0, 0, 1, 1], [], []>} : vector<8x16xf32>, vector<16x8xf32>, vector<8x8xf32> -> vector<8x8xf32>
    %cst_98 = arith.constant 2.500000e-01 : f32
    %213 = vector.broadcast %cst_98 : f32 to vector<8x8xf32>
    %214 = arith.mulf %212, %213 : vector<8x8xf32>
    %215 = vector.broadcast %44 : vector<1x8xf32> to vector<8x8xf32>
    %216 = arith.addf %214, %215 : vector<8x8xf32>
    %cst_99 = arith.constant dense<0xFF800000> : vector<8xf32>
    %217 = vector.multi_reduction <maximumf>, %216, %cst_99 [1] : vector<8x8xf32> to vector<8xf32>
    %218 = vector.shape_cast %217 : vector<8xf32> to vector<8x1xf32>
    %219 = vector.broadcast %218 : vector<8x1xf32> to vector<8x8xf32>
    %220 = arith.subf %216, %219 : vector<8x8xf32>
    %221 = math.exp %220 : vector<8x8xf32>
    %cst_100 = arith.constant dense<0.000000e+00> : vector<8xf32>
    %222 = vector.multi_reduction <add>, %221, %cst_100 [1] : vector<8x8xf32> to vector<8xf32>
    %223 = vector.shape_cast %222 : vector<8xf32> to vector<8x1xf32>
    %224 = tpu.reciprocal %223 {approx = true} : vector<8x1xf32> -> vector<8x1xf32>
    %225 = vector.broadcast %224 : vector<8x1xf32> to vector<8x8xf32>
    %226 = arith.mulf %221, %225 : vector<8x8xf32>
    %cst_101 = arith.constant dense<0.000000e+00> : vector<8x16xf32>
    %227 = tpu.matmul %226, %210, %cst_101 {dimension_numbers = #tpu.dot_dimension_numbers<[1], [0], [0], [1], [0, 0, 1, 1], [], []>} : vector<8x8xf32>, vector<8x16xf32>, vector<8x16xf32> -> vector<8x16xf32>
    %228 = tpu.concatenate %207, %227 in 1 : vector<8x16xf32>, vector<8x16xf32> -> vector<8x32xf32>
    %c1_102 = arith.constant 1 : index
    %c0_103 = arith.constant 0 : index
    %c0_104 = arith.constant 0 : index
    %229 = vector.load %arg10[%c1_102, %c0_103, %c0_104] : memref<2x32x32xf32, #tpu.memory_space<vmem>>, vector<1x32x32xf32>
    %230 = vector.shape_cast %229 : vector<1x32x32xf32> to vector<32x32xf32>
    %cst_105 = arith.constant dense<0.000000e+00> : vector<8x32xf32>
    %231 = tpu.matmul %228, %230, %cst_105 {dimension_numbers = #tpu.dot_dimension_numbers<[1], [0], [0], [1], [0, 0, 1, 1], [], []>} : vector<8x32xf32>, vector<32x32xf32>, vector<8x32xf32> -> vector<8x32xf32>
    %c1_106 = arith.constant 1 : index
    %c0_107 = arith.constant 0 : index
    %c0_108 = arith.constant 0 : index
    %232 = vector.load %arg11[%c1_106, %c0_107, %c0_108] : memref<2x1x32xf32, #tpu.memory_space<vmem>>, vector<1x1x32xf32>
    %233 = vector.shape_cast %232 : vector<1x1x32xf32> to vector<1x32xf32>
    %234 = vector.broadcast %233 : vector<1x32xf32> to vector<8x32xf32>
    %235 = arith.addf %231, %234 : vector<8x32xf32>
    %236 = arith.addf %180, %235 : vector<8x32xf32>
    %c1_109 = arith.constant 1 : index
    %c0_110 = arith.constant 0 : index
    %c0_111 = arith.constant 0 : index
    %237 = vector.load %arg12[%c1_109, %c0_110, %c0_111] : memref<2x1x32xf32, #tpu.memory_space<vmem>>, vector<1x1x32xf32>
    %238 = vector.shape_cast %237 : vector<1x1x32xf32> to vector<1x32xf32>
    %c1_112 = arith.constant 1 : index
    %c0_113 = arith.constant 0 : index
    %c0_114 = arith.constant 0 : index
    %239 = vector.load %arg13[%c1_112, %c0_113, %c0_114] : memref<2x1x32xf32, #tpu.memory_space<vmem>>, vector<1x1x32xf32>
    %240 = vector.shape_cast %239 : vector<1x1x32xf32> to vector<1x32xf32>
    %cst_115 = arith.constant dense<0.000000e+00> : vector<8xf32>
    %241 = vector.multi_reduction <add>, %236, %cst_115 [1] : vector<8x32xf32> to vector<8xf32>
    %242 = vector.shape_cast %241 : vector<8xf32> to vector<8x1xf32>
    %cst_116 = arith.constant 3.200000e+01 : f32
    %243 = vector.broadcast %cst_116 : f32 to vector<8x1xf32>
    %244 = arith.divf %242, %243 : vector<8x1xf32>
    %245 = vector.broadcast %244 : vector<8x1xf32> to vector<8x32xf32>
    %246 = arith.subf %236, %245 : vector<8x32xf32>
    %247 = arith.mulf %246, %246 : vector<8x32xf32>
    %cst_117 = arith.constant dense<0.000000e+00> : vector<8xf32>
    %248 = vector.multi_reduction <add>, %247, %cst_117 [1] : vector<8x32xf32> to vector<8xf32>
    %249 = vector.shape_cast %248 : vector<8xf32> to vector<8x1xf32>
    %cst_118 = arith.constant 3.200000e+01 : f32
    %250 = vector.broadcast %cst_118 : f32 to vector<8x1xf32>
    %251 = arith.divf %249, %250 : vector<8x1xf32>
    %252 = vector.broadcast %244 : vector<8x1xf32> to vector<8x32xf32>
    %253 = arith.subf %236, %252 : vector<8x32xf32>
    %cst_119 = arith.constant 9.99999996E-13 : f32
    %254 = vector.broadcast %cst_119 : f32 to vector<8x1xf32>
    %255 = arith.addf %251, %254 : vector<8x1xf32>
    %256 = math.rsqrt %255 : vector<8x1xf32>
    %257 = vector.broadcast %256 : vector<8x1xf32> to vector<8x32xf32>
    %258 = arith.mulf %253, %257 : vector<8x32xf32>
    %259 = vector.broadcast %238 : vector<1x32xf32> to vector<8x32xf32>
    %260 = arith.mulf %258, %259 : vector<8x32xf32>
    %261 = vector.broadcast %240 : vector<1x32xf32> to vector<8x32xf32>
    %262 = arith.addf %260, %261 : vector<8x32xf32>
    %c1_120 = arith.constant 1 : index
    %c0_121 = arith.constant 0 : index
    %c0_122 = arith.constant 0 : index
    %263 = vector.load %arg14[%c1_120, %c0_121, %c0_122] : memref<2x32x64xf32, #tpu.memory_space<vmem>>, vector<1x32x64xf32>
    %264 = vector.shape_cast %263 : vector<1x32x64xf32> to vector<32x64xf32>
    %cst_123 = arith.constant dense<0.000000e+00> : vector<8x64xf32>
    %265 = tpu.matmul %262, %264, %cst_123 {dimension_numbers = #tpu.dot_dimension_numbers<[1], [0], [0], [1], [0, 0, 1, 1], [], []>} : vector<8x32xf32>, vector<32x64xf32>, vector<8x64xf32> -> vector<8x64xf32>
    %c1_124 = arith.constant 1 : index
    %c0_125 = arith.constant 0 : index
    %c0_126 = arith.constant 0 : index
    %266 = vector.load %arg15[%c1_124, %c0_125, %c0_126] : memref<2x1x64xf32, #tpu.memory_space<vmem>>, vector<1x1x64xf32>
    %267 = vector.shape_cast %266 : vector<1x1x64xf32> to vector<1x64xf32>
    %268 = vector.broadcast %267 : vector<1x64xf32> to vector<8x64xf32>
    %269 = arith.addf %265, %268 : vector<8x64xf32>
    %270 = arith.mulf %269, %269 : vector<8x64xf32>
    %271 = arith.mulf %269, %270 : vector<8x64xf32>
    %cst_127 = arith.constant 4.471500e-02 : f32
    %272 = vector.broadcast %cst_127 : f32 to vector<8x64xf32>
    %273 = arith.mulf %272, %271 : vector<8x64xf32>
    %274 = arith.addf %269, %273 : vector<8x64xf32>
    %cst_128 = arith.constant 0.797884583 : f32
    %275 = vector.broadcast %cst_128 : f32 to vector<8x64xf32>
    %276 = arith.mulf %275, %274 : vector<8x64xf32>
    %277 = math.tanh %276 : vector<8x64xf32>
    %cst_129 = arith.constant 1.000000e+00 : f32
    %278 = vector.broadcast %cst_129 : f32 to vector<8x64xf32>
    %279 = arith.addf %278, %277 : vector<8x64xf32>
    %cst_130 = arith.constant 5.000000e-01 : f32
    %280 = vector.broadcast %cst_130 : f32 to vector<8x64xf32>
    %281 = arith.mulf %280, %279 : vector<8x64xf32>
    %282 = arith.mulf %269, %281 : vector<8x64xf32>
    %c1_131 = arith.constant 1 : index
    %c0_132 = arith.constant 0 : index
    %c0_133 = arith.constant 0 : index
    %283 = vector.load %arg16[%c1_131, %c0_132, %c0_133] : memref<2x64x32xf32, #tpu.memory_space<vmem>>, vector<1x64x32xf32>
    %284 = vector.shape_cast %283 : vector<1x64x32xf32> to vector<64x32xf32>
    %cst_134 = arith.constant dense<0.000000e+00> : vector<8x32xf32>
    %285 = tpu.matmul %282, %284, %cst_134 {dimension_numbers = #tpu.dot_dimension_numbers<[1], [0], [0], [1], [0, 0, 1, 1], [], []>} : vector<8x64xf32>, vector<64x32xf32>, vector<8x32xf32> -> vector<8x32xf32>
    %c1_135 = arith.constant 1 : index
    %c0_136 = arith.constant 0 : index
    %c0_137 = arith.constant 0 : index
    %286 = vector.load %arg17[%c1_135, %c0_136, %c0_137] : memref<2x1x32xf32, #tpu.memory_space<vmem>>, vector<1x1x32xf32>
    %287 = vector.shape_cast %286 : vector<1x1x32xf32> to vector<1x32xf32>
    %288 = vector.broadcast %287 : vector<1x32xf32> to vector<8x32xf32>
    %289 = arith.addf %285, %288 : vector<8x32xf32>
    %290 = arith.addf %262, %289 : vector<8x32xf32>
    %c1_138 = arith.constant 1 : index
    %c0_139 = arith.constant 0 : index
    %c0_140 = arith.constant 0 : index
    %291 = vector.load %arg18[%c1_138, %c0_139, %c0_140] : memref<2x1x32xf32, #tpu.memory_space<vmem>>, vector<1x1x32xf32>
    %292 = vector.shape_cast %291 : vector<1x1x32xf32> to vector<1x32xf32>
    %c1_141 = arith.constant 1 : index
    %c0_142 = arith.constant 0 : index
    %c0_143 = arith.constant 0 : index
    %293 = vector.load %arg19[%c1_141, %c0_142, %c0_143] : memref<2x1x32xf32, #tpu.memory_space<vmem>>, vector<1x1x32xf32>
    %294 = vector.shape_cast %293 : vector<1x1x32xf32> to vector<1x32xf32>
    %cst_144 = arith.constant dense<0.000000e+00> : vector<8xf32>
    %295 = vector.multi_reduction <add>, %290, %cst_144 [1] : vector<8x32xf32> to vector<8xf32>
    %296 = vector.shape_cast %295 : vector<8xf32> to vector<8x1xf32>
    %cst_145 = arith.constant 3.200000e+01 : f32
    %297 = vector.broadcast %cst_145 : f32 to vector<8x1xf32>
    %298 = arith.divf %296, %297 : vector<8x1xf32>
    %299 = vector.broadcast %298 : vector<8x1xf32> to vector<8x32xf32>
    %300 = arith.subf %290, %299 : vector<8x32xf32>
    %301 = arith.mulf %300, %300 : vector<8x32xf32>
    %cst_146 = arith.constant dense<0.000000e+00> : vector<8xf32>
    %302 = vector.multi_reduction <add>, %301, %cst_146 [1] : vector<8x32xf32> to vector<8xf32>
    %303 = vector.shape_cast %302 : vector<8xf32> to vector<8x1xf32>
    %cst_147 = arith.constant 3.200000e+01 : f32
    %304 = vector.broadcast %cst_147 : f32 to vector<8x1xf32>
    %305 = arith.divf %303, %304 : vector<8x1xf32>
    %306 = vector.broadcast %298 : vector<8x1xf32> to vector<8x32xf32>
    %307 = arith.subf %290, %306 : vector<8x32xf32>
    %cst_148 = arith.constant 9.99999996E-13 : f32
    %308 = vector.broadcast %cst_148 : f32 to vector<8x1xf32>
    %309 = arith.addf %305, %308 : vector<8x1xf32>
    %310 = math.rsqrt %309 : vector<8x1xf32>
    %311 = vector.broadcast %310 : vector<8x1xf32> to vector<8x32xf32>
    %312 = arith.mulf %307, %311 : vector<8x32xf32>
    %313 = vector.broadcast %292 : vector<1x32xf32> to vector<8x32xf32>
    %314 = arith.mulf %312, %313 : vector<8x32xf32>
    %315 = vector.broadcast %294 : vector<1x32xf32> to vector<8x32xf32>
    %316 = arith.addf %314, %315 : vector<8x32xf32>
    %317 = vector.extract_strided_slice %316 {offsets = [0, 0], sizes = [1, 32], strides = [1, 1]} : vector<8x32xf32> to vector<1x32xf32>
    %c0_149 = arith.constant 0 : index
    %c0_150 = arith.constant 0 : index
    %c0_151 = arith.constant 0 : index
    %318 = vector.load %arg20[%c0_149, %c0_150, %c0_151] : memref<1x1x32xf32, #tpu.memory_space<vmem>>, vector<1x1x32xf32>
    %319 = vector.shape_cast %318 : vector<1x1x32xf32> to vector<1x32xf32>
    %320 = vector.shape_cast %317 : vector<1x32xf32> to vector<1x1x32xf32>
    tpu.vector_store %arg20[%c0_149, %c0_150, %c0_151], %320 {strides = array<i32>} : memref<1x1x32xf32, #tpu.memory_space<vmem>>, vector<1x1x32xf32>,
    return
  }
  func.func @transform_0(%arg0: i32) -> (i32, i32, i32) {
    %c0_i32 = arith.constant 0 : i32
    %c0_i32_0 = arith.constant 0 : i32
    %c0_i32_1 = arith.constant 0 : i32
    return %arg0, %c0_i32, %c0_i32_0 : i32, i32, i32
  }
  func.func @transform_1(%arg0: i32) -> (i32, i32, i32) {
    %c0_i32 = arith.constant 0 : i32
    %c0_i32_0 = arith.constant 0 : i32
    %c0_i32_1 = arith.constant 0 : i32
    return %arg0, %c0_i32, %c0_i32_0 : i32, i32, i32
  }
  func.func @transform_2(%arg0: i32) -> (i32, i32) {
    %c0_i32 = arith.constant 0 : i32
    %c0_i32_0 = arith.constant 0 : i32
    %c0_i32_1 = arith.constant 0 : i32
    return %c0_i32, %c0_i32_0 : i32, i32
  }
  func.func @transform_3(%arg0: i32) -> (i32, i32) {
    %c0_i32 = arith.constant 0 : i32
    %c0_i32_0 = arith.constant 0 : i32
    %c0_i32_1 = arith.constant 0 : i32
    return %c0_i32, %c0_i32_0 : i32, i32
  }
  func.func @transform_4(%arg0: i32) -> (i32, i32) {
    %c0_i32 = arith.constant 0 : i32
    %c0_i32_0 = arith.constant 0 : i32
    %c0_i32_1 = arith.constant 0 : i32
    return %c0_i32, %c0_i32_0 : i32, i32
  }
  func.func @transform_5(%arg0: i32) -> (i32, i32) {
    %c0_i32 = arith.constant 0 : i32
    %c0_i32_0 = arith.constant 0 : i32
    %c0_i32_1 = arith.constant 0 : i32
    return %c0_i32, %c0_i32_0 : i32, i32
  }
  func.func @transform_6(%arg0: i32) -> (i32, i32) {
    %c0_i32 = arith.constant 0 : i32
    %c0_i32_0 = arith.constant 0 : i32
    %c0_i32_1 = arith.constant 0 : i32
    return %c0_i32, %c0_i32_0 : i32, i32
  }
  func.func @transform_7(%arg0: i32) -> (i32, i32, i32) {
    %c0_i32 = arith.constant 0 : i32
    %c0_i32_0 = arith.constant 0 : i32
    %c0_i32_1 = arith.constant 0 : i32
    %c0_i32_2 = arith.constant 0 : i32
    return %c0_i32, %c0_i32_0, %c0_i32_1 : i32, i32, i32
  }
  func.func @transform_8(%arg0: i32) -> (i32, i32, i32) {
    %c0_i32 = arith.constant 0 : i32
    %c0_i32_0 = arith.constant 0 : i32
    %c0_i32_1 = arith.constant 0 : i32
    %c0_i32_2 = arith.constant 0 : i32
    return %c0_i32, %c0_i32_0, %c0_i32_1 : i32, i32, i32
  }
  func.func @transform_9(%arg0: i32) -> (i32, i32, i32) {
    %c0_i32 = arith.constant 0 : i32
    %c0_i32_0 = arith.constant 0 : i32
    %c0_i32_1 = arith.constant 0 : i32
    %c0_i32_2 = arith.constant 0 : i32
    return %c0_i32, %c0_i32_0, %c0_i32_1 : i32, i32, i32
  }
  func.func @transform_10(%arg0: i32) -> (i32, i32, i32) {
    %c0_i32 = arith.constant 0 : i32
    %c0_i32_0 = arith.constant 0 : i32
    %c0_i32_1 = arith.constant 0 : i32
    %c0_i32_2 = arith.constant 0 : i32
    return %c0_i32, %c0_i32_0, %c0_i32_1 : i32, i32, i32
  }
  func.func @transform_11(%arg0: i32) -> (i32, i32, i32) {
    %c0_i32 = arith.constant 0 : i32
    %c0_i32_0 = arith.constant 0 : i32
    %c0_i32_1 = arith.constant 0 : i32
    %c0_i32_2 = arith.constant 0 : i32
    return %c0_i32, %c0_i32_0, %c0_i32_1 : i32, i32, i32
  }
  func.func @transform_12(%arg0: i32) -> (i32, i32, i32) {
    %c0_i32 = arith.constant 0 : i32
    %c0_i32_0 = arith.constant 0 : i32
    %c0_i32_1 = arith.constant 0 : i32
    %c0_i32_2 = arith.constant 0 : i32
    return %c0_i32, %c0_i32_0, %c0_i32_1 : i32, i32, i32
  }
  func.func @transform_13(%arg0: i32) -> (i32, i32, i32) {
    %c0_i32 = arith.constant 0 : i32
    %c0_i32_0 = arith.constant 0 : i32
    %c0_i32_1 = arith.constant 0 : i32
    %c0_i32_2 = arith.constant 0 : i32
    return %c0_i32, %c0_i32_0, %c0_i32_1 : i32, i32, i32
  }
  func.func @transform_14(%arg0: i32) -> (i32, i32, i32) {
    %c0_i32 = arith.constant 0 : i32
    %c0_i32_0 = arith.constant 0 : i32
    %c0_i32_1 = arith.constant 0 : i32
    %c0_i32_2 = arith.constant 0 : i32
    return %c0_i32, %c0_i32_0, %c0_i32_1 : i32, i32, i32
  }
  func.func @transform_15(%arg0: i32) -> (i32, i32, i32) {
    %c0_i32 = arith.constant 0 : i32
    %c0_i32_0 = arith.constant 0 : i32
    %c0_i32_1 = arith.constant 0 : i32
    %c0_i32_2 = arith.constant 0 : i32
    return %c0_i32, %c0_i32_0, %c0_i32_1 : i32, i32, i32
  }
  func.func @transform_16(%arg0: i32) -> (i32, i32, i32) {
    %c0_i32 = arith.constant 0 : i32
    %c0_i32_0 = arith.constant 0 : i32
    %c0_i32_1 = arith.constant 0 : i32
    %c0_i32_2 = arith.constant 0 : i32
    return %c0_i32, %c0_i32_0, %c0_i32_1 : i32, i32, i32
  }
  func.func @transform_17(%arg0: i32) -> (i32, i32, i32) {
    %c0_i32 = arith.constant 0 : i32
    %c0_i32_0 = arith.constant 0 : i32
    %c0_i32_1 = arith.constant 0 : i32
    %c0_i32_2 = arith.constant 0 : i32
    return %c0_i32, %c0_i32_0, %c0_i32_1 : i32, i32, i32
  }
  func.func @transform_18(%arg0: i32) -> (i32, i32, i32) {
    %c0_i32 = arith.constant 0 : i32
    %c0_i32_0 = arith.constant 0 : i32
    %c0_i32_1 = arith.constant 0 : i32
    %c0_i32_2 = arith.constant 0 : i32
    return %c0_i32, %c0_i32_0, %c0_i32_1 : i32, i32, i32
  }
  func.func @transform_19(%arg0: i32) -> (i32, i32, i32) {
    %c0_i32 = arith.constant 0 : i32
    %c0_i32_0 = arith.constant 0 : i32
    %c0_i32_1 = arith.constant 0 : i32
    return %arg0, %c0_i32, %c0_i32_0 : i32, i32, i32
  }
}

</mosaic_0001>

<bundles_post_ra>
// kernel: text_encoder_forward.1
= control target key start
LH: loop header
LB: loop body
LE: loop exit
PB: predicated region body
PF: predicated region fallthrough
CT: control target
= control target key end

     0   :  { %s3414_s0 = inlined_call_operand.vmem [shape: s32[2,8,1], index: 0, kind: input, shape index: {}]   ;;  %s3415_s1 = inlined_call_operand.vmem [shape: s32[2,1,8], index: 1, kind: input, shape index: {}]   ;;  %s3416_s2 = inlined_call_operand.vmem [shape: f32[128,32], index: 2, kind: input, shape index: {}]   ;;  %s3417_s3 = inlined_call_operand.vmem [shape: f32[8,32], index: 3, kind: input, shape index: {}]   ;;  %s3418_s4 = inlined_call_operand.vmem [shape: f32[2,32], index: 4, kind: input, shape index: {}]   ;;  %s3419_s5 = inlined_call_operand.vmem [shape: f32[1,32], index: 5, kind: input, shape index: {}]   ;;  %s3420_s6 = inlined_call_operand.vmem [shape: f32[1,32], index: 6, kind: input, shape index: {}]   ;;  %s3421_s7 = inlined_call_operand.vmem [shape: f32[2,32,96], index: 7, kind: input, shape index: {}]   ;;  %s3422_s8 = inlined_call_operand.vmem [shape: f32[2,1,96], index: 8, kind: input, shape index: {}]   ;;  %s3423_s9 = inlined_call_operand.vmem [shape: f32[2,32,32], index: 9, kind: input, shape index: {}]   ;;  %s3424_s10 = inlined_call_operand.vmem [shape: f32[2,1,32], index: 10, kind: input, shape index: {}]   ;;  %s3425_s11 = inlined_call_operand.vmem [shape: f32[2,1,32], index: 11, kind: input, shape index: {}]   ;;  %s3426_s12 = inlined_call_operand.vmem [shape: f32[2,1,32], index: 12, kind: input, shape index: {}]   ;;  %s3427_s13 = inlined_call_operand.vmem [shape: f32[2,32,64], index: 13, kind: input, shape index: {}]   ;;  %s3428_s14 = inlined_call_operand.vmem [shape: f32[2,1,64], index: 14, kind: input, shape index: {}]   ;;  %s3429_s15 = inlined_call_operand.vmem [shape: f32[2,64,32], index: 15, kind: input, shape index: {}]   ;;  %s3430_s16 = inlined_call_operand.vmem [shape: f32[2,1,32], index: 16, kind: input, shape index: {}]   ;;  %s3431_s17 = inlined_call_operand.vmem [shape: f32[2,1,32], index: 17, kind: input, shape index: {}]   ;;  %s3432_s18 = inlined_call_operand.vmem [shape: f32[2,1,32], index: 18, kind: input, shape index: {}]   ;;  %s3433_s19 = inlined_call_operand.hbm [shape: f32[2,1,32], index: 19, kind: output, shape index: {}]  }
   0x1   :  { %3444 = sst [smem:[#allocation11_spill]] %s3414_s0 }
   0x2   :  { %3445 = sst [smem:[#allocation12_spill]] %s3415_s1 }
   0x3   :  { %3446 = sst [smem:[#allocation13_spill]] %s3416_s2 }
   0x4   :  { %3447 = sst [smem:[#allocation14_spill]] %s3417_s3 }
   0x5   :  { %3448 = sst [smem:[#allocation15_spill]] %s3418_s4 }
   0x6   :  { %3449 = sst [smem:[#allocation16_spill]] %s3433_s19 }
   0x7   :  { %24 = vsyncpa [#allocation3], 0 }
   0x8   :  { %26 = vsyncpa [#allocation3 + $0x1], 0  ;;  %s2932_s0 = smov 0   ;;  %s2934_s30 = smov 0  }
   0x9   :  { %s2936_s20 = smov 0   ;;  %s2938_s21 = smov 0  }
   0xa LB: > { %3450 = sst [smem:[#allocation5_spill]] %s2807_s0  ;;  %s2953_s1 = sadd.s32 4294967295, %s2819_s21   ;;  %s2819_s21 = sphi %s2938_s21, %s3469_s21   ;;  %s2815_s20 = sphi %s2936_s20, %s3471_s20   ;;  %s2811_s30 = sphi %s2934_s30, %s3473_s30   ;;  %s2807_s0 = sphi %s2932_s0, %s3472_s0  }
   0xb   : > { %3451 = sst [smem:[#allocation6_spill]] %s2815_s20  ;;  %s2342_s22 = sadd.s32 4294967294, %s2819_s21  }
   0xc   : > { %3452 = sst [smem:[#allocation7_spill]] %s2819_s21  ;;  %s2957_s2 = sadd.s32 1, %s2819_s21  }
   0xd   : > { %3453 = sst [smem:[#allocation8_spill]] %s2957_s2  ;;  %s448_s23 = sadd.s32 1, %s2815_s20 }
   0xe   : > { %s445_s24 = ssub.s32 %s2819_s21, %s2957_s2  ;;  %p458_p0 = scmp.ne.s32.totalorder %s2815_s20, %s2811_s30 }
   0xf   : > { %p446_p1 = scmp.eq.s32.totalorder %s445_s24, 0  ;;  %p459_p2 = scmp.eq.s32.totalorder %s2953_s1, 1 }
  0x10   : > { %p464_p3 = scmp.ne.s32.totalorder %s2811_s30, %s2807_s0  ;;  %p465_p4 = scmp.eq.s32.totalorder %s2342_s22, 1 }
  0x11   : > { %s2968_s25 = scalar_select %p446_p1, %s2815_s20, %s448_s23  }
  0x12   : > { %p2970_p5 = por %p459_p2, %p458_p0  ;;  %p2974_p6 = por %p465_p4, %p464_p3 }
  0x13   : > { %3454 = sst [smem:[#allocation9_spill]] %s2968_s25  ;;  %p2345_p7 = scmp.ge.s32.totalorder %s2819_s21, 1 }
  0x14   : > { %s3456_s26 = scalar_select %p2974_p6, 1, 0 }
  0x15   : > { %p547_p8 = scmp.lt.s32.totalorder %s2819_s21, 3 }
  0x16   : > { %3457 = sst [smem:[#allocation10_spill]] %s3456_s26 }
  0x17   : > { %p548_p9 = pnand %p2345_p7, %p547_p8 }
  0x18   : > { %p604_p10 = scmp.lt.s32.totalorder (!%p548_p9), %s2953_s1, 1  ;;  %s3458_s29 = sld [smem:[#allocation13_spill]] (!%p548_p9) }
  0x19   : > { %551 = sbr.rel (%p548_p9) target bundleno = 5927 (0x1727), region = 96  ;;  %s3459_s26 = sld [smem:[#allocation12_spill]] (!%p548_p9) }
  0x1a   : > { %s3460_s21 = sld [smem:[#allocation11_spill]] (!%p548_p9)  ;;  %s2825_s28 = smov (!%p548_p9), 96  }
  0x1b   : > { %s3462_s4 = sld [smem:[#allocation15_spill]] (!%p548_p9)  ;;  %s2826_s22 = smov (!%p548_p9), 80  }
  0x1c   : > { %s3443_s23 = smov (!%p548_p9), 64   ;;  %s2828_s20 = smov (!%p548_p9), 112  }
  0x1d   : > { %s2829_s25 = smov (!%p548_p9), 48   ;;  %s3464_s2 = smov (!%p548_p9), 16  }
  0x1e   : > { %v635_v0 = vld [vmem:[%s3458_s29 + $0x78] sm:$0xff]  ;;  %v2821_v1 = vmov 0   ;;  %v2822_v2 = vmov 0.0   ;;  %v634_v3 = vld [vmem:[%s3458_s29 + $0x70] sm:$0xff]  ;;  %s605_s24 = scalar_select %p604_p10, %s2953_s1, 1  ;;  %v611_v4 = vlaneseq  ;;  %v633_v5 = vld [vmem:[%s3458_s29 + $0x68] sm:$0xff] }
  0x1f   : > { %2728 = vset.pattern.permute.xlu0 %v2821_v1  ;;  %2500 = vmatprep.subr.mxu0 %v2822_v2  ;;  %vm2823_vm0 = vmmov 0   ;;  %v632_v8 = vld [vmem:[%s3458_s29 + $0x60] sm:$0xff]  ;;  %v631_v11 = vld [vmem:[%s3458_s29 + $0x58] sm:$0xff]  ;;  %v630_v14 = vld [vmem:[%s3458_s29 + $0x50] sm:$0xff]  ;;  %v2824_v29 = vmov 1.0   ;;  %vm715_vm2 = vcmask 261120  }
  0x20   : > { %2501 = vmatpush3.msra.mxu0 %v635_v0  ;;  %2535 = vmatprep.subr.mxu1 %v2822_v2  ;;  %s2346_s27 = sshll.u32 %s605_s24, 3  ;;  %s610_s0 = scalar_lea.vmem %s3459_s26, %s605_s24  ;;  %v913_v6 = vshrl.u32 %v611_v4, 7  ;;  %v629_v16 = vld [vmem:[%s3458_s29 + $0x48] sm:$0xff]  ;;  %v628_v18 = vld [vmem:[%s3458_s29 + $0x40] sm:$0xff]  ;;  %v627_v19 = vld [vmem:[%s3458_s29 + $0x38] sm:$0xff]  ;;  %v612_v27 = vand.u32 127, %v611_v4 }
  0x21   : > { %2502 = vmatprep.subr.mxu0 %v2822_v2  ;;  %2532 = vmatprep.mubr.msk.f32.mxu0 %vm2823_vm0, %v2822_v2  ;;  %s607_s19 = scalar_lea.vmem %s3460_s21, %s2346_s27  ;;  %v744_v7 = vld [vmem:[%s610_s0] sm:$0x1]  ;;  %v626_v20 = vld [vmem:[%s3458_s29 + $0x30] sm:$0xff]  ;;  %v625_v21 = vld [vmem:[%s3458_s29 + $0x28] sm:$0xff]  ;;  %s3461_s0 = sld [smem:[#allocation14_spill]]  ;;  %vm835_vm3 = vcmask 130048  }
  0x22   : > { %2503 = vmatpush3.msra.mxu0 %v634_v3  ;;  %2543 = vmatprep.mubr.msk.f32.mxu1 %vm2823_vm0, %v2822_v2  ;;  %v613_v9 = vld [vmem:[%s607_s19] sm:$0xff]  ;;  %v745_v10 = vcvt.s32.f32 %v744_v7  ;;  %v914_v13 = vsub.s32 0, %v913_v6  ;;  %v623_v23 = vld [vmem:[%s3458_s29 + $0x18] sm:$0xff]  ;;  %v622_v24 = vld [vmem:[%s3458_s29 + $0x10] sm:$0xff]  ;;  %vm918_vm4 = vcmask 64512   ;;  %s3442_s26 = smov 16  }
  0x23   : > { %2504 = vmatprep.subr.mxu0 %v2822_v2  ;;  %615 = vperm.xlu0 %2728, %v613_v9   ;;  %v624_v22 = vld [vmem:[%s3458_s29 + $0x20] sm:$0xff]  ;;  %v621_v25 = vld [vmem:[%s3458_s29 + $0x8] sm:$0xff]  ;;  %v751_v42 = vld [vmem:[%s3421_s7 + $0x18] sm:$0xff]  ;;  %vm1400_vm5 = vcmask 523264   ;;  %s602_s27 = sand.u32 1, %s2811_s30   ;;  %vm2263_vm6 = vcmask 253952  }
  0x24   : > { %2505 = vmatpush3.msra.mxu0 %v633_v5  ;;  %v746_v12 = vsub.f32 1.0, %v745_v10  ;;  %v620_v26 = vld [vmem:[%s3458_s29] sm:$0xff]  ;;  %v750_v43 = vld [vmem:[%s3421_s7 + $0x10] sm:$0xff]  ;;  %2536 = vmatpush3.msra.mxu1 %v751_v42  ;;  %v749_v44 = vld [vmem:[%s3421_s7 + $0x8] sm:$0xff]  ;;  %s3465_s19 = sld [smem:[#allocation16_spill]] }
  0x25   : > { %2506 = vmatprep.subr.mxu0 %v2822_v2  ;;  %v2349_v32 = vld [vmem:[%s3462_s4] ss:$0 sm:$0xff]  ;;  %2537 = vmatprep.subr.mxu1 %v2822_v2 }
  0x26   : > { %2507 = vmatpush3.msra.mxu0 %v632_v8  ;;  %v747_v15 = vmul.f32 -10000.0, %v746_v12  ;;  %2538 = vmatpush3.msra.mxu1 %v750_v43  ;;  %v748_v45 = vld [vmem:[%s3421_s7] sm:$0xff] }
  0x27   : > { %2508 = vmatprep.subr.mxu0 %v2822_v2  ;;  %v636_v30 = vld [vmem:[%s3461_s0] sm:$0xff]  ;;  %2539 = vmatprep.subr.mxu1 %v2822_v2 }
  0x28   : > { %2509 = vmatpush3.msra.mxu0 %v631_v11  ;;  %v3020_v17 = vrot.slane %v747_v15, %v914_v13  ;;  %2540 = vmatpush3.msra.mxu1 %v749_v44  ;;  %v2350_v50 = vld [vmem:[%s3419_s5] ss:$0 sm:$0xff] }
  0x29   : > { %2510 = vmatprep.subr.mxu0 %v2822_v2  ;;  %2541 = vmatprep.subr.mxu1 %v2822_v2  ;;  %v2351_v52 = vld [vmem:[%s3420_s6] ss:$0 sm:$0xff] }
  0x2a   : > { %2511 = vmatpush3.msra.mxu0 %v630_v14  ;;  %2542 = vmatpush3.msra.mxu1 %v748_v45  ;;  %v2352_v55 = vld [vmem:[%s3422_s8] ss:$0 sm:$0xff] }
  0x2b   : > { %2512 = vmatprep.subr.mxu0 %v2822_v2  ;;  %2546 = vmatprep.subr.mxu1 %v2822_v2 }
  0x2c   : > { %2513 = vmatpush3.msra.mxu0 %v629_v16 }
  0x2d   : > { %2514 = vmatprep.subr.mxu0 %v2822_v2 }
  0x2e   : > { %2515 = vmatpush3.msra.mxu0 %v628_v18 }
  0x2f   : > { %2516 = vmatprep.subr.mxu0 %v2822_v2 }
  0x30   : > { %2517 = vmatpush3.msra.mxu0 %v627_v19 }
  0x31   : > { %2518 = vmatprep.subr.mxu0 %v2822_v2 }
  0x32   : > { %2519 = vmatpush3.msra.mxu0 %v626_v20 }
  0x33   : > { %2520 = vmatprep.subr.mxu0 %v2822_v2 }
  0x34   : > { %2521 = vmatpush3.msra.mxu0 %v625_v21 }
  0x35   : > { %2522 = vmatprep.subr.mxu0 %v2822_v2 }
  0x36   : > { %2523 = vmatpush3.msra.mxu0 %v624_v22 }
  0x37   : > { %2524 = vmatprep.subr.mxu0 %v2822_v2 }
  0x38   : > { %2525 = vmatpush3.msra.mxu0 %v623_v23 }
  0x39   : > { %2526 = vmatprep.subr.mxu0 %v2822_v2 }
  0x3a   : > { %2527 = vmatpush3.msra.mxu0 %v622_v24 }
  0x3b   : > { %2528 = vmatprep.subr.mxu0 %v2822_v2 }
  0x3c   : > { %2529 = vmatpush3.msra.mxu0 %v621_v25 }
  0x3d   : > { %2530 = vmatprep.subr.mxu0 %v2822_v2 }
  0x3e   : > { %2531 = vmatpush3.msra.mxu0 %v620_v26 }
  0x3f   : > { %2607 = vmatprep.subr.mxu0 %v2822_v2 }
  0x9e   : > { %v616_v28 = vpop.permute.xlu0 %615 }
  0x9f   : > { %vm617_vm1 = vcmp.eq.s32.totalorder %v612_v27, %v616_v28 }
  0xa0   : > { %2533 = vmatmul.mubr.msk.f32.vlgmr.msra.gmra.mxu0 %vm617_vm1, %v2824_v29 }
  0xa1   : > { %2615 = vmatprep.mubr.msk.f32.mxu0 %vm2823_vm0, %v2822_v2 }
 0x160   : > { %v703_v31 = vpop.f32.mrf.mxu0 }
 0x161   : > { %v704_v33 = vadd.f32 %v703_v31, %v636_v30  ;;  %v1181_v30 = vld [vmem:[%s3423_s9 + $0x18] sm:$0xff]  ;;  %v1180_v31 = vld [vmem:[%s3423_s9 + $0x10] sm:$0xff] }
 0x162   : > { %v2534_v34 = vpop.f32.mrf.mxu0 }
 0x163   : > { %v712_v35 = vadd.f32 %v2349_v32, %v704_v33  ;;  %v1179_v32 = vld [vmem:[%s3423_s9 + $0x8] sm:$0xff]  ;;  %v1178_v33 = vld [vmem:[%s3423_s9] sm:$0xff] }
 0x165   : > { %v716_v36 = vsel %vm715_vm2, %v712_v35, 0.0 }
 0x166   : > { %717 = vadd.xlane.f32.xlu0 %v716_v36 }
 0x1ef   : > { %v718_v37 = vpop.xlane.xlu0 %717 }
 0x1f0   : > { %v720_v38 = vmul.f32 0.03125, %v718_v37 }
 0x1f2   : > { %v721_v39 = vsub.f32 %v712_v35, %v720_v38  ;;  %v2360_v38 = vld [vmem:[%s3424_s10] ss:$0 sm:$0xff] }
 0x1f4   : > { %v722_v40 = vmul.f32 %v721_v39, %v721_v39 }
 0x1f6   : > { %v723_v41 = vsel %vm715_vm2, %v722_v40, 0.0 }
 0x1f7   : > { %724 = vadd.xlane.f32.xlu1 %v723_v41 }
 0x280   : > { %v725_v46 = vpop.xlane.xlu1 %724 }
 0x281   : > { %v726_v47 = vmul.f32 0.03125, %v725_v46 }
 0x283   : > { %v727_v48 = vadd.f32 1e-12, %v726_v47 }
 0x285   : > { %2729 = vrsqrt.f32 %v727_v48 }
 0x292   : > { %v2730_v49 = vpop.eup %2729 }
 0x293   : > { %v729_v51 = vmul.f32 %v2730_v49, %v721_v39  ;;  %v1295_v49 = vld [vmem:[%s3427_s13 + $0x18] sm:$0xff] }
 0x295   : > { %v736_v53 = vmul.f32 %v2350_v50, %v729_v51  ;;  %v1294_v50 = vld [vmem:[%s3427_s13 + $0x10] sm:$0xff]  ;;  %v1293_v51 = vld [vmem:[%s3427_s13 + $0x8] sm:$0xff] }
 0x297   : > { %v3092_v54 = vadd.f32 %v2351_v52, %v736_v53  ;;  %v1292_v52 = vld [vmem:[%s3427_s13] sm:$0xff] }
 0x299   : > { %2544 = vmatmul.mubr.msk.f32.vlgmr.msra.gmra.mxu1 %vm715_vm2, %v3092_v54 }
 0x29a   : > { %2548 = vmatprep.mubr.msk.f32.mxu1 %vm2823_vm0, %v2822_v2 }
 0x359   : > { %v828_v56 = vpop.f32.mrf.mxu1 }
 0x35a   : > { %v829_v57 = vadd.f32 %v2352_v55, %v828_v56 }
 0x35b   : > { %v2545_v58 = vpop.f32.mrf.mxu1 }
 0x35c   : > { %833 = vrot.lane.b32.xlu1 %v829_v57, %s2825_s28 }
 0x3ce   : > { %v834_v59 = vpop.permute.xlu1 %833 }
 0x3cf   : > { %2547 = vmatpush3.xpose.msk.msra.mxu1 %vm835_vm3, %v834_v59  ;;  %v2363_v59 = vld [vmem:[%s3426_s12] ss:$0 sm:$0xff] }
 0x3d0   : > { %2551 = vmatprep.subr.mxu1 %v2822_v2 }
 0x3d2   : > { %2549 = vmatmul.mubr.msk.f32.vlgmr.msra.gmra.mxu1 %vm835_vm3, %v829_v57 }
 0x3d3   : > { %2553 = vmatprep.mubr.msk.f32.mxu1 %vm2823_vm0, %v2822_v2 }
 0x492   : > { %v906_v60 = vpop.f32.mrf.mxu1 }
 0x493   : > { %v910_v61 = vmul.f32 0.25, %v906_v60 }
 0x494   : > { %v2550_v62 = vpop.f32.mrf.mxu1 }
 0x495   : > { %v917_v63 = vadd.f32 %v3020_v17, %v910_v61  ;;  %v1392_v62 = vld [vmem:[%s3429_s15 + $0x38] sm:$0xff] }
 0x497   : > { %v919_v0 = vsel %vm918_vm4, %v917_v63, -inf }
 0x498   : > { %920 = vmax.xlane.f32.xlu1 %v919_v0  ;;  %v1390_v0 = vld [vmem:[%s3429_s15 + $0x28] sm:$0xff] }
 0x4a9   : > { %1008 = vrot.lane.b32.xlu1 %v829_v57, %s2826_s22 }
 0x521   : > { %v921_v1 = vpop.xlane.xlu1 %920 }
 0x522   : > { %v922_v3 = vsub.f32 %v917_v63, %v921_v1  ;;  %v1391_v63 = vld [vmem:[%s3429_s15 + $0x30] sm:$0xff]  ;;  %v1389_v1 = vld [vmem:[%s3429_s15 + $0x20] sm:$0xff] }
 0x524   : > { %v923_v4 = vmul.f32 1.442695, %v922_v3  ;;  %v1388_v3 = vld [vmem:[%s3429_s15 + $0x18] sm:$0xff] }
 0x525   : > { %v1009_v11 = vpop.permute.xlu1 %1008 }
 0x526   : > { %2731 = vpow2.f32 %v923_v4  ;;  %v1387_v4 = vld [vmem:[%s3429_s15 + $0x10] sm:$0xff] }
 0x533   : > { %v2732_v5 = vpop.eup %2731 }
 0x534   : > { %v925_v6 = vsel %vm918_vm4, %v2732_v5, 0.0 }
 0x535   : > { %926 = vadd.xlane.f32.xlu0 %v925_v6  ;;  %v1385_v6 = vld [vmem:[%s3429_s15] sm:$0xff] }
 0x54b   : > { %930 = vrot.lane.b32.xlu0 %v829_v57, %s3443_s23 }
 0x54f   : > { %1006 = vrot.lane.b32.xlu0 %v829_v57, %s2828_s20 }
 0x5be   : > { %v927_v7 = vpop.xlane.xlu0 %926 }
 0x5bf   : > { %2733 = vrcp.f32 %v927_v7  ;;  %v2364_v7 = vld [vmem:[%s3428_s14] ss:$0 sm:$0xff] }
 0x5c2   : > { %v931_v8 = vpop.permute.xlu0 %930 }
 0x5c3   : > { %2552 = vmatpush3.msra.mxu1 %v931_v8 }
 0x5c4   : > { %2556 = vmatprep.subr.mxu1 %v2822_v2 }
 0x5c6   : > { %v1007_v12 = vpop.permute.xlu0 %1006 }
 0x5cc   : > { %v2734_v9 = vpop.eup %2733 }
 0x5cd   : > { %v929_v10 = vmul.f32 %v2734_v9, %v2732_v5  ;;  %v1386_v5 = vld [vmem:[%s3429_s15 + $0x8] sm:$0xff] }
 0x5cf   : > { %2554 = vmatmul.mubr.msk.f32.vlgmr.msra.gmra.mxu1 %vm918_vm4, %v929_v10 }
 0x5d0   : > { %2557 = vmatpush3.xpose.msk.msra.mxu1 %vm835_vm3, %v1009_v11  ;;  %2558 = vmatprep.mubr.msk.f32.mxu1 %vm2823_vm0, %v2822_v2 }
 0x5d1   : > { %2561 = vmatprep.subr.mxu1 %v2822_v2 }
 0x5d3   : > { %2559 = vmatmul.mubr.msk.f32.vlgmr.msra.gmra.mxu1 %vm835_vm3, %v1007_v12 }
 0x5d4   : > { %2563 = vmatprep.mubr.msk.f32.mxu1 %vm2823_vm0, %v2822_v2 }
 0x68f   : > { %v1002_v13 = vpop.f32.mrf.mxu1 }
 0x691   : > { %v2555_v14 = vpop.f32.mrf.mxu1 }
 0x693   : > { %v1080_v15 = vpop.f32.mrf.mxu1 }
 0x694   : > { %v1084_v16 = vmul.f32 0.25, %v1080_v15 }
 0x695   : > { %v2560_v18 = vpop.f32.mrf.mxu1 }
 0x696   : > { %v1085_v19 = vadd.f32 %v1084_v16, %v3020_v17 }
 0x698   : > { %v1086_v20 = vsel %vm918_vm4, %v1085_v19, -inf }
 0x699   : > { %1087 = vmax.xlane.f32.xlu0 %v1086_v20 }
 0x6af   : > { %1097 = vrot.lane.b32.xlu0 %v829_v57, %s2829_s25  ;;  %v2362_v57 = vld [vmem:[%s3425_s11] ss:$0 sm:$0xff] }
 0x722   : > { %v1088_v21 = vpop.xlane.xlu0 %1087 }
 0x723   : > { %v1089_v22 = vsub.f32 %v1085_v19, %v1088_v21  ;;  %v2366_v21 = vld [vmem:[%s3430_s16] ss:$0 sm:$0xff] }
 0x725   : > { %v1090_v23 = vmul.f32 1.442695, %v1089_v22 }
 0x726   : > { %v1098_v24 = vpop.permute.xlu0 %1097 }
 0x727   : > { %2735 = vpow2.f32 %v1090_v23  ;;  %2562 = vmatpush3.msra.mxu1 %v1098_v24 }
 0x728   : > { %2566 = vmatprep.subr.mxu1 %v2822_v2 }
 0x734   : > { %v2736_v25 = vpop.eup %2735 }
 0x735   : > { %v1092_v26 = vsel %vm918_vm4, %v2736_v25, 0.0 }
 0x736   : > { %1093 = vadd.xlane.f32.xlu1 %v1092_v26 }
 0x7bf   : > { %v1094_v27 = vpop.xlane.xlu1 %1093 }
 0x7c0   : > { %2737 = vrcp.f32 %v1094_v27 }
 0x7cd   : > { %v2738_v28 = vpop.eup %2737 }
 0x7ce   : > { %v1096_v29 = vmul.f32 %v2738_v28, %v2736_v25 }
 0x7d0   : > { %2564 = vmatmul.mubr.msk.f32.vlgmr.msra.gmra.mxu1 %vm918_vm4, %v1096_v29 }
 0x7d1   : > { %2574 = vmatprep.mubr.msk.f32.mxu1 %vm2823_vm0, %v2822_v2  ;;  %2567 = vmatpush3.msra.mxu1 %v1181_v30 }
 0x7d2   : > { %2568 = vmatprep.subr.mxu1 %v2822_v2 }
 0x7d3   : > { %2569 = vmatpush3.msra.mxu1 %v1180_v31 }
 0x7d4   : > { %2570 = vmatprep.subr.mxu1 %v2822_v2 }
 0x7d5   : > { %2571 = vmatpush3.msra.mxu1 %v1179_v32  ;;  %v2373_v32 = vld [vmem:[%s3421_s7 + $0x38] sm:$0xff] }
 0x7d6   : > { %2572 = vmatprep.subr.mxu1 %v2822_v2  ;;  %2608 = vmatpush3.msra.mxu0 %v2373_v32 }
 0x7d7   : > { %2573 = vmatpush3.msra.mxu1 %v1178_v33  ;;  %v2372_v33 = vld [vmem:[%s3421_s7 + $0x30] sm:$0xff]  ;;  %2609 = vmatprep.subr.mxu0 %v2822_v2 }
 0x7d8   : > { %2577 = vmatprep.subr.mxu1 %v2822_v2  ;;  %2610 = vmatpush3.msra.mxu0 %v2372_v33 }
 0x7d9   : > { %2611 = vmatprep.subr.mxu0 %v2822_v2 }
 0x890   : > { %v1169_v34 = vpop.f32.mrf.mxu1 }
 0x891   : > { %1174 = vrot.lane.b32.xlu1 %v1169_v34, %s3442_s26  ;;  %v2371_v34 = vld [vmem:[%s3421_s7 + $0x28] sm:$0xff]  ;;  %s2831_s26 = smov [#allocation2]  }
 0x892   : > { %v2565_v35 = vpop.f32.mrf.mxu1  ;;  %2612 = vmatpush3.msra.mxu0 %v2371_v34 }
 0x893   : > { %v2370_v35 = vld [vmem:[%s3421_s7 + $0x20] sm:$0xff]  ;;  %2613 = vmatprep.subr.mxu0 %v2822_v2 }
 0x894   : > { %2614 = vmatpush3.msra.mxu0 %v2370_v35 }
 0x895   : > { %2618 = vmatprep.subr.mxu0 %v2822_v2 }
 0x903   : > { %v1175_v36 = vpop.permute.xlu1 %1174 }
 0x904   : > { %v1177_v37 = vsel %vm835_vm3, %v1002_v13, %v1175_v36 }
 0x905   : > { %2575 = vmatmul.mubr.msk.f32.vlgmr.msra.gmra.mxu1 %vm715_vm2, %v1177_v37 }
 0x906   : > { %2585 = vmatprep.mubr.msk.f32.mxu1 %vm2823_vm0, %v2822_v2  ;;  %2578 = vmatpush3.msra.mxu1 %v1295_v49 }
 0x907   : > { %2579 = vmatprep.subr.mxu1 %v2822_v2 }
 0x908   : > { %2580 = vmatpush3.msra.mxu1 %v1294_v50 }
 0x909   : > { %2581 = vmatprep.subr.mxu1 %v2822_v2 }
 0x90a   : > { %2582 = vmatpush3.msra.mxu1 %v1293_v51 }
 0x90b   : > { %2583 = vmatprep.subr.mxu1 %v2822_v2 }
 0x90c   : > { %2584 = vmatpush3.msra.mxu1 %v1292_v52 }
 0x90d   : > { %2588 = vmatprep.subr.mxu1 %v2822_v2 }
 0x9c5   : > { %v1258_v39 = vpop.f32.mrf.mxu1 }
 0x9c6   : > { %v1259_v40 = vadd.f32 %v2360_v38, %v1258_v39 }
 0x9c7   : > { %v2576_v41 = vpop.f32.mrf.mxu1 }
 0x9c8   : > { %v1262_v42 = vadd.f32 %v1259_v40, %v3092_v54  ;;  %v2368_v40 = vld [vmem:[%s3431_s17] ss:$0 sm:$0xff] }
 0x9ca   : > { %v1265_v43 = vsel %vm715_vm2, %v1262_v42, 0.0 }
 0x9cb   : > { %1266 = vadd.xlane.f32.xlu0 %v1265_v43 }
 0xa54   : > { %v1267_v44 = vpop.xlane.xlu0 %1266 }
 0xa55   : > { %v1268_v45 = vmul.f32 0.03125, %v1267_v44 }
 0xa57   : > { %v1269_v46 = vsub.f32 %v1262_v42, %v1268_v45  ;;  %v2369_v42 = vld [vmem:[%s3432_s18] ss:$0 sm:$0xff]  ;;  %v2375_v45 = vld [vmem:[%s3422_s8 + $0x1] ss:$0 sm:$0xff] }
 0xa59   : > { %v1270_v47 = vmul.f32 %v1269_v46, %v1269_v46 }
 0xa5b   : > { %v1271_v48 = vsel %vm715_vm2, %v1270_v47, 0.0 }
 0xa5c   : > { %1272 = vadd.xlane.f32.xlu1 %v1271_v48 }
 0xae5   : > { %v1273_v53 = vpop.xlane.xlu1 %1272 }
 0xae6   : > { %v1274_v54 = vmul.f32 0.03125, %v1273_v53 }
 0xae8   : > { %v1275_v55 = vadd.f32 1e-12, %v1274_v54 }
 0xaea   : > { %2739 = vrsqrt.f32 %v1275_v55 }
 0xaf7   : > { %v2740_v56 = vpop.eup %2739 }
 0xaf8   : > { %v1277_v58 = vmul.f32 %v2740_v56, %v1269_v46 }
 0xafa   : > { %v1284_v60 = vmul.f32 %v2362_v57, %v1277_v58 }
 0xafc   : > { %v1291_v61 = vadd.f32 %v2363_v59, %v1284_v60 }
 0xafe   : > { %2586 = vmatmul.mubr.msk.f32.vlgmr.msra.gmra.mxu1 %vm715_vm2, %v1291_v61 }
 0xaff   : > { %2604 = vmatprep.mubr.msk.f32.mxu1 %vm2823_vm0, %v2822_v2  ;;  %2589 = vmatpush3.msra.mxu1 %v1392_v62 }
 0xb00   : > { %2590 = vmatprep.subr.mxu1 %v2822_v2 }
 0xb01   : > { %2591 = vmatpush3.msra.mxu1 %v1391_v63 }
 0xb02   : > { %2592 = vmatprep.subr.mxu1 %v2822_v2 }
 0xb03   : > { %2593 = vmatpush3.msra.mxu1 %v1390_v0 }
 0xb04   : > { %2594 = vmatprep.subr.mxu1 %v2822_v2 }
 0xb05   : > { %2595 = vmatpush3.msra.mxu1 %v1389_v1 }
 0xb06   : > { %2596 = vmatprep.subr.mxu1 %v2822_v2 }
 0xb07   : > { %2597 = vmatpush3.msra.mxu1 %v1388_v3 }
 0xb08   : > { %2598 = vmatprep.subr.mxu1 %v2822_v2 }
 0xb09   : > { %2599 = vmatpush3.msra.mxu1 %v1387_v4 }
 0xb0a   : > { %2600 = vmatprep.subr.mxu1 %v2822_v2 }
 0xb0b   : > { %2601 = vmatpush3.msra.mxu1 %v1386_v5 }
 0xb0c   : > { %2602 = vmatprep.subr.mxu1 %v2822_v2 }
 0xb0d   : > { %2603 = vmatpush3.msra.mxu1 %v1385_v6 }
 0xb0e   : > { %2623 = vmatprep.subr.mxu1 %v2822_v2 }
 0xbbe   : > { %v1372_v8 = vpop.f32.mrf.mxu1 }
 0xbbf   : > { %v1373_v9 = vadd.f32 %v2364_v7, %v1372_v8 }
 0xbc0   : > { %v2587_v10 = vpop.f32.mrf.mxu1 }
 0xbc1   : > { %v1376_v11 = vmul.f32 %v1373_v9, %v1373_v9 }
 0xbc3   : > { %v1377_v12 = vmul.f32 %v1376_v11, %v1373_v9 }
 0xbc5   : > { %v1378_v13 = vmul.f32 0.044715, %v1377_v12 }
 0xbc7   : > { %v1379_v14 = vadd.f32 %v1378_v13, %v1373_v9 }
 0xbc9   : > { %v1380_v15 = vmul.f32 0.7978846, %v1379_v14 }
 0xbcb   : > { %2741 = vtanh.f32 %v1380_v15 }
 0xbd8   : > { %v2742_v16 = vpop.eup %2741 }
 0xbd9   : > { %v1382_v18 = vadd.f32 1.0, %v2742_v16  ;;  %v2386_v16 = vld [vmem:[%s3423_s9 + $0x38] sm:$0xff] }
 0xbdb   : > { %v1383_v19 = vmul.f32 0.5, %v1382_v18  ;;  %v2385_v18 = vld [vmem:[%s3423_s9 + $0x30] sm:$0xff] }
 0xbdd   : > { %v1384_v20 = vmul.f32 %v1383_v19, %v1373_v9  ;;  %v2384_v19 = vld [vmem:[%s3423_s9 + $0x28] sm:$0xff] }
 0xbdf   : > { %2605 = vmatmul.mubr.msk.f32.vlgmr.msra.gmra.mxu1 %vm1400_vm5, %v1384_v20  ;;  %v2383_v20 = vld [vmem:[%s3423_s9 + $0x20] sm:$0xff] }
 0xbe0   : > { %2625 = vmatprep.mubr.msk.f32.mxu1 %vm2823_vm0, %v2822_v2 }
 0xc9f   : > { %v1470_v22 = vpop.f32.mrf.mxu1 }
 0xca0   : > { %v1471_v23 = vadd.f32 %v2366_v21, %v1470_v22 }
 0xca1   : > { %v2606_v24 = vpop.f32.mrf.mxu1 }
 0xca2   : > { %v1474_v25 = vadd.f32 %v1471_v23, %v1291_v61 }
 0xca4   : > { %v1477_v26 = vsel %vm715_vm2, %v1474_v25, 0.0 }
 0xca5   : > { %1478 = vadd.xlane.f32.xlu0 %v1477_v26 }
 0xd2e   : > { %v1479_v27 = vpop.xlane.xlu0 %1478 }
 0xd2f   : > { %v1480_v28 = vmul.f32 0.03125, %v1479_v27  ;;  %v2388_v27 = vld [vmem:[%s3424_s10 + $0x1] ss:$0 sm:$0xff] }
 0xd31   : > { %v1481_v29 = vsub.f32 %v1474_v25, %v1480_v28 }
 0xd33   : > { %v1482_v30 = vmul.f32 %v1481_v29, %v1481_v29 }
 0xd35   : > { %v1483_v31 = vsel %vm715_vm2, %v1482_v30, 0.0 }
 0xd36   : > { %1484 = vadd.xlane.f32.xlu0 %v1483_v31 }
 0xdbf   : > { %v1485_v36 = vpop.xlane.xlu0 %1484 }
 0xdc0   : > { %v1486_v37 = vmul.f32 0.03125, %v1485_v36 }
 0xdc2   : > { %v1487_v38 = vadd.f32 1e-12, %v1486_v37 }
 0xdc4   : > { %2743 = vrsqrt.f32 %v1487_v38  ;;  %v2397_v38 = vld [vmem:[%s3427_s13 + $0x38] sm:$0xff] }
 0xdd1   : > { %v2744_v39 = vpop.eup %2743 }
 0xdd2   : > { %v1489_v41 = vmul.f32 %v2744_v39, %v1481_v29  ;;  %v2396_v39 = vld [vmem:[%s3427_s13 + $0x30] sm:$0xff] }
 0xdd4   : > { %v1496_v43 = vmul.f32 %v2368_v40, %v1489_v41  ;;  %v2395_v40 = vld [vmem:[%s3427_s13 + $0x28] sm:$0xff]  ;;  %v2394_v41 = vld [vmem:[%s3427_s13 + $0x20] sm:$0xff] }
 0xdd6   : > { %v3247_v44 = vadd.f32 %v2369_v42, %v1496_v43 }
 0xdd8   : > { %2616 = vmatmul.mubr.msk.f32.vlgmr.msra.gmra.mxu0 %vm715_vm2, %v3247_v44 }
 0xdd9   : > { %2620 = vmatprep.mubr.msk.f32.mxu0 %vm2823_vm0, %v2822_v2 }
 0xe98   : > { %v1586_v46 = vpop.f32.mrf.mxu0 }
 0xe99   : > { %v1587_v47 = vadd.f32 %v2375_v45, %v1586_v46  ;;  %v2392_v46 = vld [vmem:[%s3425_s11 + $0x1] ss:$0 sm:$0xff] }
 0xe9a   : > { %v2617_v48 = vpop.f32.mrf.mxu0 }
 0xe9b   : > { %1758 = vrot.lane.b32.xlu1 %v1587_v47, %s2826_s22  ;;  %1591 = vrot.lane.b32.xlu0 %v1587_v47, %s2825_s28  ;;  %s3463_s28 = smov 64   ;;  %v2393_v48 = vld [vmem:[%s3426_s12 + $0x1] ss:$0 sm:$0xff]  ;;  %s2416_s22 = sshll.u32 %s2953_s1, 4 }
 0xe9c   : > { %s2276_s24 = scalar_lea.hbm %s3465_s19, %s2416_s22 }
 0xe9f   : > { %1756 = vrot.lane.b32.xlu0 %v1587_v47, %s2828_s20  ;;  %s603_s20 = scalar_lea.vmem [#allocation2], %s602_s27 }
 0xf0d   : > { %v1592_v49 = vpop.permute.xlu0 %1591  ;;  %v1759_v50 = vpop.permute.xlu1 %1758 }
 0xf0e   : > { %2619 = vmatpush3.xpose.msk.msra.mxu0 %vm835_vm3, %v1592_v49 }
 0xf0f   : > { %2628 = vmatprep.subr.mxu0 %v2822_v2 }
 0xf11   : > { %2621 = vmatmul.mubr.msk.f32.vlgmr.msra.gmra.mxu0 %vm835_vm3, %v1587_v47  ;;  %v1757_v51 = vpop.permute.xlu0 %1756 }
 0xf12   : > { %2629 = vmatpush3.xpose.msk.msra.mxu0 %vm835_vm3, %v1759_v50  ;;  %2630 = vmatprep.mubr.msk.f32.mxu0 %vm2823_vm0, %v2822_v2 }
 0xf13   : > { %2638 = vmatprep.subr.mxu0 %v2822_v2 }
 0xf15   : > { %2631 = vmatmul.mubr.msk.f32.vlgmr.msra.gmra.mxu0 %vm835_vm3, %v1757_v51  ;;  %v2408_v51 = vld [vmem:[%s3429_s15 + $0x78] sm:$0xff] }
 0xf16   : > { %2646 = vmatprep.mubr.msk.f32.mxu0 %vm2823_vm0, %v2822_v2  ;;  %2639 = vmatpush3.msra.mxu0 %v2386_v16 }
 0xf17   : > { %2640 = vmatprep.subr.mxu0 %v2822_v2 }
 0xf18   : > { %2641 = vmatpush3.msra.mxu0 %v2385_v18 }
 0xf19   : > { %2642 = vmatprep.subr.mxu0 %v2822_v2 }
 0xf1a   : > { %2643 = vmatpush3.msra.mxu0 %v2384_v19 }
 0xf1b   : > { %2644 = vmatprep.subr.mxu0 %v2822_v2 }
 0xf1c   : > { %2645 = vmatpush3.msra.mxu0 %v2383_v20 }
 0xf1d   : > { %2660 = vmatprep.subr.mxu0 %v2822_v2 }
 0xfd1   : > { %v1663_v52 = vpop.f32.mrf.mxu0 }
 0xfd2   : > { %v1667_v53 = vmul.f32 0.25, %v1663_v52  ;;  %v2407_v52 = vld [vmem:[%s3429_s15 + $0x70] sm:$0xff] }
 0xfd3   : > { %v2622_v54 = vpop.f32.mrf.mxu0 }
 0xfd4   : > { %v1668_v55 = vadd.f32 %v1667_v53, %v3020_v17  ;;  %v2406_v53 = vld [vmem:[%s3429_s15 + $0x68] sm:$0xff]  ;;  %v2405_v54 = vld [vmem:[%s3429_s15 + $0x60] sm:$0xff] }
 0xfd5   : > { %v1830_v56 = vpop.f32.mrf.mxu0 }
 0xfd6   : > { %v1834_v57 = vmul.f32 0.25, %v1830_v56  ;;  %v1669_v58 = vsel %vm918_vm4, %v1668_v55, -inf  ;;  %v2403_v56 = vld [vmem:[%s3429_s15 + $0x50] sm:$0xff] }
 0xfd7   : > { %1670 = vmax.xlane.f32.xlu1 %v1669_v58  ;;  %v2632_v59 = vpop.f32.mrf.mxu0  ;;  %v2401_v58 = vld [vmem:[%s3429_s15 + $0x40] sm:$0xff] }
 0xfd8   : > { %v1835_v60 = vadd.f32 %v1834_v57, %v3020_v17  ;;  %v2402_v57 = vld [vmem:[%s3429_s15 + $0x48] sm:$0xff]  ;;  %v2399_v59 = vld [vmem:[%s3428_s14 + $0x1] ss:$0 sm:$0xff] }
 0xfda   : > { %v1836_v61 = vsel %vm918_vm4, %v1835_v60, -inf }
 0xfdb   : > { %1837 = vmax.xlane.f32.xlu0 %v1836_v61 }
0x1060   : > { %v1671_v62 = vpop.xlane.xlu1 %1670 }
0x1061   : > { %v1672_v63 = vsub.f32 %v1668_v55, %v1671_v62  ;;  %v2404_v55 = vld [vmem:[%s3429_s15 + $0x58] sm:$0xff] }
0x1063   : > { %v1673_v0 = vmul.f32 1.442695, %v1672_v63 }
0x1064   : > { %v1838_v1 = vpop.xlane.xlu0 %1837 }
0x1065   : > { %2745 = vpow2.f32 %v1673_v0  ;;  %v1839_v3 = vsub.f32 %v1835_v60, %v1838_v1 }
0x1067   : > { %v1840_v4 = vmul.f32 1.442695, %v1839_v3 }
0x1069   : > { %2747 = vpow2.f32 %v1840_v4 }
0x1072   : > { %v2746_v5 = vpop.eup %2745 }
0x1073   : > { %v1675_v6 = vsel %vm918_vm4, %v2746_v5, 0.0 }
0x1074   : > { %1676 = vadd.xlane.f32.xlu0 %v1675_v6 }
0x1076   : > { %v2748_v7 = vpop.eup %2747 }
0x1077   : > { %v1842_v8 = vsel %vm918_vm4, %v2748_v7, 0.0 }
0x1078   : > { %1843 = vadd.xlane.f32.xlu1 %v1842_v8 }
0x1089   : > { %1847 = vrot.lane.b32.xlu1 %v1587_v47, %s2829_s25  ;;  %s2278_s25 = sshll.u32 %s603_s20, 4  ;;  %s2279_s25 = int_to_ptr.vmem [resolvable:$true] %s2278_s25 }
0x108a   : > { %1680 = vrot.lane.b32.xlu0 %v1587_v47, %s3463_s28  ;;  %s2759_s23 = scalar_lea.vmem %s2279_s25, 16  ;;  %s2763_s28 = sshll.u32 %s2831_s26, 4  ;;  %s2764_s28 = int_to_ptr.vmem [resolvable:$false] %s2763_s28 }
0x108b   : > { %p2760_p11 = scmp.ne.s32.totalorder %s2279_s25, %s2759_s23  ;;  %s2765_s1 = scalar_lea.vmem %s2764_s28, 32 }
0x108c   : > { %p2766_p0 = scmp.lt.s32.totalorder %s2279_s25, %s2764_s28  ;;  %p2767_p1 = scmp.lt.s32.totalorder %s2765_s1, %s2759_s23 }
0x108d   : > { %p2761_p12 = pnand %p2760_p11, %p2970_p5 }
0x108e   : > { %p2768_p2 = por %p2767_p1, %p2766_p0 }
0x108f   : > { %p2762_p13 = pneg %p2761_p12 }
0x1091   : > { %p2769_p3 = pnand %p2768_p2, %p2762_p13 }
0x10fd   : > { %v1677_v17 = vpop.xlane.xlu0 %1676 }
0x10fe   : > { %2749 = vrcp.f32 %v1677_v17 }
0x1101   : > { %v1844_v9 = vpop.xlane.xlu1 %1843  ;;  %v1681_v10 = vpop.permute.xlu0 %1680 }
0x1102   : > { %2751 = vrcp.f32 %v1844_v9  ;;  %2624 = vmatpush3.msra.mxu1 %v1681_v10 }
0x1103   : > { %2633 = vmatprep.subr.mxu1 %v2822_v2 }
0x1105   : > { %v1848_v13 = vpop.permute.xlu1 %1847 }
0x110b   : > { %v2750_v11 = vpop.eup %2749 }
0x110c   : > { %v1679_v12 = vmul.f32 %v2750_v11, %v2746_v5 }
0x110e   : > { %2626 = vmatmul.mubr.msk.f32.vlgmr.msra.gmra.mxu1 %vm918_vm4, %v1679_v12 }
0x110f   : > { %v2752_v14 = vpop.eup %2751  ;;  %2634 = vmatpush3.msra.mxu1 %v1848_v13  ;;  %2635 = vmatprep.mubr.msk.f32.mxu1 %vm2823_vm0, %v2822_v2 }
0x1110   : > { %v1846_v15 = vmul.f32 %v2752_v14, %v2748_v7  ;;  %2649 = vmatprep.subr.mxu1 %v2822_v2 }
0x1112   : > { %2636 = vmatmul.mubr.msk.f32.vlgmr.msra.gmra.mxu1 %vm918_vm4, %v1846_v15 }
0x1113   : > { %2657 = vmatprep.mubr.msk.f32.mxu1 %vm2823_vm0, %v2822_v2  ;;  %2650 = vmatpush3.msra.mxu1 %v2397_v38 }
0x1114   : > { %2651 = vmatprep.subr.mxu1 %v2822_v2 }
0x1115   : > { %2652 = vmatpush3.msra.mxu1 %v2396_v39 }
0x1116   : > { %2653 = vmatprep.subr.mxu1 %v2822_v2 }
0x1117   : > { %2654 = vmatpush3.msra.mxu1 %v2395_v40 }
0x1118   : > { %2655 = vmatprep.subr.mxu1 %v2822_v2 }
0x1119   : > { %2656 = vmatpush3.msra.mxu1 %v2394_v41 }
0x11ce   : > { %v1752_v21 = vpop.f32.mrf.mxu1 }
0x11d0   : > { %v2627_v22 = vpop.f32.mrf.mxu1 }
0x11d2   : > { %v1919_v23 = vpop.f32.mrf.mxu1 }
0x11d3   : > { %1924 = vrot.lane.b32.xlu1 %v1919_v23, %s3464_s2  ;;  %v2414_v23 = vld [vmem:[%s3431_s17 + $0x1] ss:$0 sm:$0xff]  ;;  %s2266_s2 = scalar_lea.sflag [#allocation3], %s602_s27 }
0x11d4   : > { %v2637_v24 = vpop.f32.mrf.mxu1 }
0x1245   : > { %v1925_v25 = vpop.permute.xlu1 %1924 }
0x1246   : > { %v1927_v26 = vsel %vm835_vm3, %v1752_v21, %v1925_v25  ;;  %v2415_v25 = vld [vmem:[%s3432_s18 + $0x1] ss:$0 sm:$0xff] }
0x1247   : > { %2647 = vmatmul.mubr.msk.f32.vlgmr.msra.gmra.mxu0 %vm715_vm2, %v1927_v26 }
0x1248   : > { %2676 = vmatprep.mubr.msk.f32.mxu0 %vm2823_vm0, %v2822_v2  ;;  %2661 = vmatpush3.msra.mxu0 %v2408_v51 }
0x1249   : > { %2662 = vmatprep.subr.mxu0 %v2822_v2 }
0x124a   : > { %2663 = vmatpush3.msra.mxu0 %v2407_v52 }
0x124b   : > { %2664 = vmatprep.subr.mxu0 %v2822_v2 }
0x124c   : > { %2665 = vmatpush3.msra.mxu0 %v2406_v53 }
0x124d   : > { %2666 = vmatprep.subr.mxu0 %v2822_v2 }
0x124e   : > { %2667 = vmatpush3.msra.mxu0 %v2405_v54 }
0x124f   : > { %2668 = vmatprep.subr.mxu0 %v2822_v2 }
0x1250   : > { %2669 = vmatpush3.msra.mxu0 %v2404_v55 }
0x1251   : > { %2670 = vmatprep.subr.mxu0 %v2822_v2 }
0x1252   : > { %2671 = vmatpush3.msra.mxu0 %v2403_v56 }
0x1253   : > { %2672 = vmatprep.subr.mxu0 %v2822_v2 }
0x1254   : > { %2673 = vmatpush3.msra.mxu0 %v2402_v57 }
0x1255   : > { %2674 = vmatprep.subr.mxu0 %v2822_v2  ;;  %v2410_v2 = vld [vmem:[%s3430_s16 + $0x1] ss:$0 sm:$0xff] }
0x1256   : > { %2675 = vmatpush3.msra.mxu0 %v2401_v58 }
0x1307   : > { %v2010_v28 = vpop.f32.mrf.mxu0 }
0x1308   : > { %v2011_v29 = vadd.f32 %v2388_v27, %v2010_v28 }
0x1309   : > { %v2648_v30 = vpop.f32.mrf.mxu0 }
0x130a   : > { %v2014_v31 = vadd.f32 %v2011_v29, %v3247_v44 }
0x130c   : > { %v2019_v32 = vsel %vm715_vm2, %v2014_v31, 0.0 }
0x130d   : > { %2020 = vadd.xlane.f32.xlu0 %v2019_v32 }
0x1396   : > { %v2021_v33 = vpop.xlane.xlu0 %2020 }
0x1397   : > { %v2022_v34 = vmul.f32 0.03125, %v2021_v33 }
0x1399   : > { %v2023_v35 = vsub.f32 %v2014_v31, %v2022_v34 }
0x139b   : > { %v2024_v36 = vmul.f32 %v2023_v35, %v2023_v35 }
0x139d   : > { %v2025_v37 = vsel %vm715_vm2, %v2024_v36, 0.0 }
0x139e   : > { %2026 = vadd.xlane.f32.xlu1 %v2025_v37 }
0x1427   : > { %v2027_v42 = vpop.xlane.xlu1 %2026 }
0x1428   : > { %v2028_v43 = vmul.f32 0.03125, %v2027_v42 }
0x142a   : > { %v2029_v44 = vadd.f32 1e-12, %v2028_v43 }
0x142c   : > { %2753 = vrsqrt.f32 %v2029_v44 }
0x1439   : > { %v2754_v45 = vpop.eup %2753 }
0x143a   : > { %v2031_v47 = vmul.f32 %v2754_v45, %v2023_v35 }
0x143c   : > { %v2038_v49 = vmul.f32 %v2392_v46, %v2031_v47 }
0x143e   : > { %v2045_v50 = vadd.f32 %v2393_v48, %v2038_v49 }
0x1440   : > { %2658 = vmatmul.mubr.msk.f32.vlgmr.msra.gmra.mxu1 %vm715_vm2, %v2045_v50 }
0x1500   : > { %v2128_v60 = vpop.f32.mrf.mxu1 }
0x1501   : > { %v2129_v61 = vadd.f32 %v2399_v59, %v2128_v60 }
0x1502   : > { %v2659_v62 = vpop.f32.mrf.mxu1 }
0x1503   : > { %v2132_v63 = vmul.f32 %v2129_v61, %v2129_v61 }
0x1505   : > { %v2133_v0 = vmul.f32 %v2132_v63, %v2129_v61 }
0x1507   : > { %v2134_v1 = vmul.f32 0.044715, %v2133_v0 }
0x1509   : > { %v2135_v3 = vadd.f32 %v2134_v1, %v2129_v61 }
0x150b   : > { %v2136_v4 = vmul.f32 0.7978846, %v2135_v3 }
0x150d   : > { %2755 = vtanh.f32 %v2136_v4 }
0x151a   : > { %v2756_v5 = vpop.eup %2755 }
0x151b   : > { %v2138_v6 = vadd.f32 1.0, %v2756_v5 }
0x151d   : > { %v2139_v7 = vmul.f32 0.5, %v2138_v6 }
0x151f   : > { %v2140_v8 = vmul.f32 %v2139_v7, %v2129_v61 }
0x1521   : > { %2677 = vmatmul.mubr.msk.f32.vlgmr.msra.gmra.mxu0 %vm1400_vm5, %v2140_v8 }
0x15e1   : > { %v2227_v17 = vpop.f32.mrf.mxu0 }
0x15e2   : > { %v2228_v9 = vadd.f32 %v2410_v2, %v2227_v17 }
0x15e3   : > { %v2678_v10 = vpop.f32.mrf.mxu0 }
0x15e4   : > { %v2231_v11 = vadd.f32 %v2228_v9, %v2045_v50 }
0x15e6   : > { %v2236_v12 = vsel %vm715_vm2, %v2231_v11, 0.0 }
0x15e7   : > { %2237 = vadd.xlane.f32.xlu0 %v2236_v12 }
0x1670   : > { %v2238_v13 = vpop.xlane.xlu0 %2237 }
0x1671   : > { %v2239_v14 = vmul.f32 0.03125, %v2238_v13 }
0x1673   : > { %v2240_v15 = vsub.f32 %v2231_v11, %v2239_v14 }
0x1675   : > { %v2241_v16 = vmul.f32 %v2240_v15, %v2240_v15 }
0x1677   : > { %v2242_v18 = vsel %vm715_vm2, %v2241_v16, 0.0 }
0x1678   : > { %2243 = vadd.xlane.f32.xlu0 %v2242_v18 }
0x1701   : > { %v2244_v19 = vpop.xlane.xlu0 %2243 }
0x1702   : > { %v2245_v20 = vmul.f32 0.03125, %v2244_v19 }
0x1704   : > { %v2246_v21 = vadd.f32 1e-12, %v2245_v20 }
0x1706   : > { %2757 = vrsqrt.f32 %v2246_v21 }
0x1713   : > { %v2758_v22 = vpop.eup %2757 }
0x1714   : > { %v2248_v24 = vmul.f32 %v2758_v22, %v2240_v15 }
0x1716   : > { %v2255_v26 = vmul.f32 %v2414_v23, %v2248_v24 }
0x1718   : > { %v2262_v27 = vadd.f32 %v2415_v25, %v2255_v26 }
0x171a   : > { %2264 = vst.msk [vmem:[%s603_s20] sm:$0x1] %vm2263_vm6, %v2262_v27 }
0x171b   : > { %2772 = shalt.err (!%p2769_p3)
}
0x171c   : > { %s2773_s4 = scalar_lea.hbm %s2276_s24, 16  ;;  %s2777_s20 = scalar_lea.hbm %s3465_s19, 32 }
0x171d   : > { %p2774_p4 = scmp.ne.s32.totalorder %s2276_s24, %s2773_s4  ;;  %p2778_p9 = scmp.lt.s32.totalorder %s2276_s24, %s3465_s19 }
0x171e   : > { %p2779_p10 = scmp.lt.s32.totalorder %s2777_s20, %s2773_s4 }
0x171f   : > { %p2775_p7 = pnand %p2774_p4, %p2970_p5 }
0x1720   : > { %p2780_p11 = por %p2779_p10, %p2778_p9 }
0x1721   : > { %p2776_p8 = pneg %p2775_p7 }
0x1723   : > { %p2781_p12 = pnand %p2780_p11, %p2776_p8 }
0x1725   : > { %2784 = shalt.err (!%p2781_p12)
}
0x1726   : > { %2679 = dma.vmem_to_hbm [thread:$0]  (%p2970_p5), %s2279_s25, 16, %s2276_s24, %s2266_s2  }
0x1727 PF: > { %s3466_s23 = sld [smem:[#allocation7_spill]] }
0x1728   : > { %s3467_s26 = sld [smem:[#allocation5_spill]] }
0x172d   : > { %p2685_p13 = scmp.ge.s32.totalorder %s3466_s23, 2 }
0x172e   : > { %s2290_s1 = sand.u32 1, %s3467_s26  }
0x172f   : > { %p2682_p0 = pnand %p2685_p13, %p2974_p6  ;;  %s2291_s27 = scalar_lea.sflag [#allocation3], %s2290_s1 }
0x1731   : > { %p2683_p1 = pneg %p2682_p0 }
0x1733   : > { %2802 = dma.done.wait (%p2683_p1), %s2291_s27, 16  }
0x1734   : > { %2804 = vsyncadd (%p2683_p1), %s2291_s27, 4294967280  ;;  %s3469_s21 = sld [smem:[#allocation8_spill]]  ;;  %s3472_s0 = smov %s2811_s30 }
0x1735   : > { %s3470_s4 = sld [smem:[#allocation6_spill]] }
0x1736   : > { %s3471_s20 = sld [smem:[#allocation9_spill]] }
0x173a   : > { %p29_p2 = scmp.ge.s32.totalorder %s3469_s21, 4  }
0x173b   : > { %s3473_s30 = smov %s3470_s4 }
0x173c   :  { %31 = sbr.rel (!%p29_p2) target bundleno = 10 (0xa), region = 146 }
0x1741   :  { %2295 = vsyncpa [#allocation3], 1 }
0x1742   :  { %2297 = vsyncpa [#allocation3 + $0x1], 1 }

</bundles_post_ra>
